<compile_context>
chip_gen: v5e
topology: v5e:2x2
jax: 0.10.0
libtpu: 0.0.40
codegen_flags: <defaults>
</compile_context>

<pallas_src>
import math

import jax
import jax.numpy as jnp
from jax.experimental import pallas as pl
from jax.experimental.pallas import tpu as pltpu


# ----------------------------------------------------------------------------
# Parameter init (deterministic JAX port of init_nd_freqs)
# ----------------------------------------------------------------------------
def init_nd_freqs_jax(position_dim, head_dim, num_heads, theta=10.0,
                      rotate=True, key=None, dtype=jnp.float32):
    thetas = jnp.full((position_dim,), theta, dtype=dtype)
    # mag: (position_dim, head_dim // 4)
    mag = 1.0 / thetas[:, None] ** (
        jnp.arange(0, head_dim, 4, dtype=dtype)[None, :] / head_dim
    )
    freqs_per_dim = [[] for _ in range(position_dim)]
    for _ in range(num_heads):
        if rotate:
            key, sub = jax.random.split(key)
            angle = jax.random.uniform(sub, (1,), dtype=dtype) * 2.0 * jnp.pi
        else:
            angle = jnp.zeros((1,), dtype=dtype)
        for i in range(position_dim):
            f = jnp.concatenate(
                [
                    mag[i] * jnp.cos(angle + jnp.pi * (2 * i) / (2 * position_dim)),
                    mag[i] * jnp.cos(angle + jnp.pi * (2 * i + 1) / (2 * position_dim)),
                ],
                axis=-1,
            )
            freqs_per_dim[i].append(f)
    freqs = [jnp.stack(fs, axis=0) for fs in freqs_per_dim]
    freqs = jnp.stack(freqs, axis=-1)  # (num_heads, head_dim//2, position_dim)
    assert freqs.shape == (num_heads, head_dim // 2, position_dim)
    return freqs


# ----------------------------------------------------------------------------
# In-kernel helpers
# ----------------------------------------------------------------------------
def _cos_sin_signed(pos_ref, freqs_ref):
    """angles = pos @ freqs_exp via VPU rank-1 accumulation (K = pos_dim is tiny).

    freqs_exp is already lane-expanded x2, so cos/sin come out directly in the
    interleaved (tn, d_model) layout.  Returns cos, sign-folded sin, parity mask.
    """
    pos = pos_ref[...].astype(jnp.float32)        # (tn, pos_dim)
    fr = freqs_ref[...].astype(jnp.float32)       # (pos_dim, d_model)
    pos_dim = fr.shape[0]
    angles = pos[:, 0:1] * fr[0:1, :]             # (tn, d_model)
    for k in range(1, pos_dim):
        angles = angles + pos[:, k:k + 1] * fr[k:k + 1, :]
    cos = jnp.cos(angles)
    sin = jnp.sin(angles)
    lane = jax.lax.broadcasted_iota(jnp.int32, angles.shape, 1)
    is_even = (lane & 1) == 0
    # real lanes (even) get -sin, imag lanes (odd) get +sin
    sin_signed = jnp.where(is_even, -sin, sin)
    return cos, sin_signed, is_even


def _rotate_tile(x_ref, o_ref, cos, sin_signed, is_even):
    """out[2j]   = x[2j]*cos_j - x[2j+1]*sin_j
       out[2j+1] = x[2j]*sin_j + x[2j+1]*cos_j
    implemented as x*cos + swap_pairs(x)*sin_signed, with the pair swap done by
    two lane rotations + parity select (stays lane-dense, no reshape)."""
    x = x_ref[...]
    cdt = jnp.bfloat16 if x.dtype == jnp.bfloat16 else jnp.float32
    xc = x.astype(cdt)
    n = xc.shape[-1]
    x_next = pltpu.roll(xc, shift=n - 1, axis=1)   # x[i+1]  (roll by -1 mod n)
    x_prev = pltpu.roll(xc, shift=1, axis=1)       # x[i-1]
    x_swap = jnp.where(is_even, x_next, x_prev)
    out = xc * cos.astype(cdt) + x_swap * sin_signed.astype(cdt)
    o_ref[...] = out.astype(o_ref.dtype)


# ----------------------------------------------------------------------------
# Kernels
# ----------------------------------------------------------------------------
def _rope_kernel_single(pos_ref, freqs_ref, x_ref, o_ref):
    cos, sin_s, is_even = _cos_sin_signed(pos_ref, freqs_ref)
    _rotate_tile(x_ref, o_ref, cos, sin_s, is_even)


def _rope_kernel_qk_shared(pos_ref, freqs_ref, q_ref, k_ref, oq_ref, ok_ref):
    # shared positions: angles / cos / sin computed once for both Q and K
    cos, sin_s, is_even = _cos_sin_signed(pos_ref, freqs_ref)
    _rotate_tile(q_ref, oq_ref, cos, sin_s, is_even)
    _rotate_tile(k_ref, ok_ref, cos, sin_s, is_even)


def _rope_kernel_qk_sep(qpos_ref, kpos_ref, freqs_ref, q_ref, k_ref, oq_ref, ok_ref):
    cos_q, sin_q, is_even = _cos_sin_signed(qpos_ref, freqs_ref)
    _rotate_tile(q_ref, oq_ref, cos_q, sin_q, is_even)
    cos_k, sin_k, _ = _cos_sin_signed(kpos_ref, freqs_ref)
    _rotate_tile(k_ref, ok_ref, cos_k, sin_k, is_even)


# ----------------------------------------------------------------------------
# Tiling / wrapper plumbing
# ----------------------------------------------------------------------------
def _round_up(x, m):
    return ((x + m - 1) // m) * m


def _choose_tile(N, d_model, n_big_slabs, itemsize, row_align,
                 max_tile=1024, slab_budget_bytes=32 * 1024 * 1024):
    # Budget the double-buffered big in/out slabs to ~32 MiB so we fit v7x's
    # 64 MiB VMEM with headroom; cap the tile at 1024 rows.
    per_row = 2 * n_big_slabs * d_model * itemsize
    t = slab_budget_bytes // max(per_row, 1)
    t = int(max(row_align, min(max_tile, t)))
    t = (t // row_align) * row_align
    if N <= t:
        return _round_up(max(N, 1), row_align)
    return t


def _vmem_limit_bytes(tn, d_model, n_big_slabs, n_pos_inputs, itemsize):
    big = 2 * n_big_slabs * tn * d_model * itemsize
    pos = 2 * n_pos_inputs * tn * 128 * 4          # pos blocks pad to 128 lanes
    freqs = 2 * 8 * d_model * 4
    est = big + pos + freqs + (8 << 20)            # headroom for compiler temps
    return int(min(56 << 20, max(32 << 20, est)))


def _pad_rows(a, n_rows):
    if a.shape[0] == n_rows:
        return a
    return jnp.pad(a, ((0, n_rows - a.shape[0]), (0, 0)))


def _apply_rope_single(freqs_exp, x, pos, *, max_tile=1024):
    N, d_model = x.shape
    pos_dim = pos.shape[1]
    itemsize = jnp.dtype(x.dtype).itemsize
    row_align = 16 if itemsize == 2 else 8
    tn = _choose_tile(N, d_model, 2, itemsize, row_align, max_tile)
    N_pad = _round_up(N, tn)
    xp = _pad_rows(x, N_pad)
    pp = _pad_rows(pos, N_pad)

    out = pl.pallas_call(
        _rope_kernel_single,
        out_shape=jax.ShapeDtypeStruct((N_pad, d_model), x.dtype),
        grid_spec=pltpu.PrefetchScalarGridSpec(
            num_scalar_prefetch=0,
            grid=(N_pad // tn,),
            in_specs=[
                pl.BlockSpec((tn, pos_dim), lambda i: (i, 0)),
                pl.BlockSpec((pos_dim, d_model), lambda i: (0, 0)),
                pl.BlockSpec((tn, d_model), lambda i: (i, 0)),
            ],
            out_specs=pl.BlockSpec((tn, d_model), lambda i: (i, 0)),
        ),
        compiler_params=pltpu.CompilerParams(
            dimension_semantics=("parallel",),
            vmem_limit_bytes=_vmem_limit_bytes(tn, d_model, 2, 1, itemsize),
        ),
    )(pp, freqs_exp, xp)
    return out[:N] if N_pad != N else out


def _apply_rope_fused(freqs_exp, q, qpos, k, kpos, *, max_tile=1024):
    """Fused Q+K rotation in one pallas_call; kpos=None => share angles."""
    N, d_model = q.shape
    pos_dim = qpos.shape[1]
    itemsize = jnp.dtype(q.dtype).itemsize
    row_align = 16 if itemsize == 2 else 8
    tn = _choose_tile(N, d_model, 4, itemsize, row_align, max_tile)
    N_pad = _round_up(N, tn)
    qp = _pad_rows(q, N_pad)
    kp = _pad_rows(k, N_pad)
    qpp = _pad_rows(qpos, N_pad)

    big_spec = pl.BlockSpec((tn, d_model), lambda i: (i, 0))
    pos_spec = pl.BlockSpec((tn, pos_dim), lambda i: (i, 0))
    freqs_spec = pl.BlockSpec((pos_dim, d_model), lambda i: (0, 0))
    out_shape = (jax.ShapeDtypeStruct((N_pad, d_model), q.dtype),
                 jax.ShapeDtypeStruct((N_pad, d_model), k.dtype))
    shared = kpos is None
    cparams = pltpu.CompilerParams(
        dimension_semantics=("parallel",),
        vmem_limit_bytes=_vmem_limit_bytes(tn, d_model, 4, 1 if shared else 2,
                                           itemsize),
    )

    if shared:
        oq, ok = pl.pallas_call(
            _rope_kernel_qk_shared,
            out_shape=out_shape,
            grid_spec=pltpu.PrefetchScalarGridSpec(
                num_scalar_prefetch=0,
                grid=(N_pad // tn,),
                in_specs=[pos_spec, freqs_spec, big_spec, big_spec],
                out_specs=[big_spec, big_spec],
            ),
            compiler_params=cparams,
        )(qpp, freqs_exp, qp, kp)
    else:
        kpp = _pad_rows(kpos, N_pad)
        oq, ok = pl.pallas_call(
            _rope_kernel_qk_sep,
            out_shape=out_shape,
            grid_spec=pltpu.PrefetchScalarGridSpec(
                num_scalar_prefetch=0,
                grid=(N_pad // tn,),
                in_specs=[pos_spec, pos_spec, freqs_spec, big_spec, big_spec],
                out_specs=[big_spec, big_spec],
            ),
            compiler_params=cparams,
        )(qpp, kpp, freqs_exp, qp, kp)

    if N_pad != N:
        oq, ok = oq[:N], ok[:N]
    return oq, ok


# ----------------------------------------------------------------------------
# Module-level wrapper mirroring RoPEEncodingND.forward
# ----------------------------------------------------------------------------
class RoPEEncodingNDPallas:
    def __init__(self, position_dim, d_model, n_heads, rope_base_theta=10.0,
                 key=None, dtype=jnp.float32):
        assert d_model % n_heads == 0
        self.head_dim = d_model // n_heads
        assert self.head_dim % 2 == 0
        self.pos_dim = position_dim
        self.d_model = d_model
        self.n_heads = n_heads
        if key is None:
            key = jax.random.PRNGKey(0)
        self.freqs = init_nd_freqs_jax(
            position_dim, self.head_dim, n_heads, rope_base_theta,
            rotate=True, key=key, dtype=dtype,
        )
        hd2 = self.head_dim // 2
        # lane-expanded, pre-transposed freqs: (pos_dim, d_model).  Each (head,
        # pair) frequency is duplicated onto its adjacent real/imag lanes so the
        # kernel computes cos/sin directly in the interleaved layout with no
        # in-kernel transpose.
        fe = jnp.repeat(self.freqs.reshape(n_heads * hd2, position_dim), 2, axis=0)
        self.freqs_expanded = fe.T.astype(jnp.float32)

    def _shape_check(self, qk, qk_pos):
        assert qk.ndim == qk_pos.ndim
        assert qk.shape[-1] == self.d_model
        assert qk_pos.shape[-1] == self.pos_dim
        assert qk.shape[:-1] == qk_pos.shape[:-1]

    def _flatten(self, x, pos):
        lead = x.shape[:-1]
        N = math.prod(lead) if lead else 1
        return (x.reshape(N, self.d_model),
                pos.reshape(N, self.pos_dim).astype(jnp.float32),
                lead)

    def __call__(self, query, query_pos, key=None, key_pos=None):
        self._shape_check(query, query_pos)
        # TODO(synk): normalized-coordinate warning omitted (data-dependent host-side check)
        if key_pos is not None and key is not None:
            self._shape_check(key, key_pos)

        q2, qp2, q_lead = self._flatten(query, query_pos)
        out_tail = (self.n_heads, self.head_dim)

        if key is None:
            oq = _apply_rope_single(self.freqs_expanded, q2, qp2)
            return oq.reshape(q_lead + out_tail)

        if key.shape == query.shape:
            k2 = key.reshape(-1, self.d_model)
            kp2 = None
            if key_pos is not None:
                kp2 = key_pos.reshape(-1, self.pos_dim).astype(jnp.float32)
            oq, ok = _apply_rope_fused(self.freqs_expanded, q2, qp2, k2, kp2)
            return (oq.reshape(q_lead + out_tail),
                    ok.reshape(key.shape[:-1] + out_tail))

        # different Q/K leading shapes: two separate calls
        kpos = key_pos if key_pos is not None else query_pos
        k2, kp2, k_lead = self._flatten(key, kpos)
        oq = _apply_rope_single(self.freqs_expanded, q2, qp2)
        ok = _apply_rope_single(self.freqs_expanded, k2, kp2)
        return oq.reshape(q_lead + out_tail), ok.reshape(k_lead + out_tail)


# ----------------------------------------------------------------------------
# Pure-JAX reference (mirrors the torch math) for a correctness check
# ----------------------------------------------------------------------------
def _rope_reference(qk, pos, freqs):
    *lead, d_model = qk.shape
    n_heads, hd2, pos_dim = freqs.shape
    N = math.prod(lead) if lead else 1
    angles = pos.reshape(N, pos_dim).astype(jnp.float32) @ freqs.reshape(-1, pos_dim).T
    angles = angles.reshape(tuple(lead) + (n_heads, hd2))
    cos, sin = jnp.cos(angles), jnp.sin(angles)
    q = qk.reshape(tuple(lead) + (n_heads, hd2, 2)).astype(jnp.float32)
    qe, qo = q[..., 0], q[..., 1]
    oe = qe * cos - qo * sin
    oo = qe * sin + qo * cos
    return jnp.stack([oe, oo], axis=-1).reshape(
        tuple(lead) + (n_heads, 2 * hd2)).astype(qk.dtype)


if __name__ == "__main__":
    # Small shapes consistent with the module (lane-dense d_model):
    batch, seq = 2, 16
    pos_dim, d_model, n_heads = 2, 128, 4      # head_dim = 32

    root = jax.random.PRNGKey(0)
    k_freq, k_q, k_k, k_qp, k_kp = jax.random.split(root, 5)

    rope = RoPEEncodingNDPallas(pos_dim, d_model, n_heads, rope_base_theta=10.0,
                                key=k_freq)

    query = jax.random.normal(k_q, (batch, seq, d_model), dtype=jnp.float32)
    key_t = jax.random.normal(k_k, (batch, seq, d_model), dtype=jnp.float32)
    # un-normalized coordinates (e.g. pixel coords), as the module expects
    query_pos = jax.random.uniform(k_qp, (batch, seq, pos_dim)) * 50.0
    key_pos = jax.random.uniform(k_kp, (batch, seq, pos_dim)) * 50.0

    # fused Q+K with separate positions
    q_rot, k_rot = rope(query, query_pos, key_t, key_pos)
    # fused Q+K with shared positions (key_pos=None path, angles reused)
    q_rot2, k_rot2 = rope(query, query_pos, key_t)
    # query-only path
    q_rot3 = rope(query, query_pos)
    jax.block_until_ready((q_rot, k_rot, q_rot2, k_rot2, q_rot3))

    assert q_rot.shape == (batch, seq, n_heads, d_model // n_heads)
    assert k_rot.shape == (batch, seq, n_heads, d_model // n_heads)

    q_ref = _rope_reference(query, query_pos, rope.freqs)
    k_ref = _rope_reference(key_t, key_pos, rope.freqs)
    k_ref_shared = _rope_reference(key_t, query_pos, rope.freqs)

    assert jnp.allclose(q_rot, q_ref, atol=2e-4, rtol=2e-4)
    assert jnp.allclose(k_rot, k_ref, atol=2e-4, rtol=2e-4)
    assert jnp.allclose(q_rot2, q_ref, atol=2e-4, rtol=2e-4)
    assert jnp.allclose(k_rot2, k_ref_shared, atol=2e-4, rtol=2e-4)
    assert jnp.allclose(q_rot3, q_ref, atol=2e-4, rtol=2e-4)

    print("KERNEL_OK")
</pallas_src>

<mosaic_0001>
module attributes {stable_mosaic.version = 11 : i64} {
  func.func @_rope_kernel_qk_sep(%arg0: i32, %arg1: memref<32x2xf32, #tpu.memory_space<vmem>>, %arg2: memref<32x2xf32, #tpu.memory_space<vmem>>, %arg3: memref<2x128xf32, #tpu.memory_space<vmem>>, %arg4: memref<32x128xf32, #tpu.memory_space<vmem>>, %arg5: memref<32x128xf32, #tpu.memory_space<vmem>>, %arg6: memref<32x128xf32, #tpu.memory_space<vmem>>, %arg7: memref<32x128xf32, #tpu.memory_space<vmem>>) attributes {dimension_semantics = [#tpu.dimension_semantics<parallel>], iteration_bounds = array<i64: 1>, scalar_prefetch = 0 : i64, scratch_operands = 0 : i64, tpu.core_type = #tpu.core_type<tc>, window_params = [{transform_indices = @transform_0, window_bounds = array<i64: 32, 2>}, {transform_indices = @transform_1, window_bounds = array<i64: 32, 2>}, {pipeline_mode = #tpu.pipeline_mode<synchronous>, transform_indices = @transform_2, window_bounds = array<i64: 2, 128>}, {transform_indices = @transform_3, window_bounds = array<i64: 32, 128>}, {transform_indices = @transform_4, window_bounds = array<i64: 32, 128>}, {transform_indices = @transform_5, window_bounds = array<i64: 32, 128>}, {transform_indices = @transform_6, window_bounds = array<i64: 32, 128>}]} {
    %c0 = arith.constant 0 : index
    %c0_0 = arith.constant 0 : index
    %0 = vector.load %arg1[%c0, %c0_0] : memref<32x2xf32, #tpu.memory_space<vmem>>, vector<32x2xf32>
    %c0_1 = arith.constant 0 : index
    %c0_2 = arith.constant 0 : index
    %1 = vector.load %arg3[%c0_1, %c0_2] : memref<2x128xf32, #tpu.memory_space<vmem>>, vector<2x128xf32>
    %2 = vector.extract_strided_slice %0 {offsets = [0, 0], sizes = [32, 1], strides = [1, 1]} : vector<32x2xf32> to vector<32x1xf32>
    %3 = vector.extract_strided_slice %1 {offsets = [0, 0], sizes = [1, 128], strides = [1, 1]} : vector<2x128xf32> to vector<1x128xf32>
    %4 = vector.broadcast %2 : vector<32x1xf32> to vector<32x128xf32>
    %5 = vector.broadcast %3 : vector<1x128xf32> to vector<32x128xf32>
    %6 = arith.mulf %4, %5 : vector<32x128xf32>
    %7 = vector.extract_strided_slice %0 {offsets = [0, 1], sizes = [32, 1], strides = [1, 1]} : vector<32x2xf32> to vector<32x1xf32>
    %8 = vector.extract_strided_slice %1 {offsets = [1, 0], sizes = [1, 128], strides = [1, 1]} : vector<2x128xf32> to vector<1x128xf32>
    %9 = vector.broadcast %7 : vector<32x1xf32> to vector<32x128xf32>
    %10 = vector.broadcast %8 : vector<1x128xf32> to vector<32x128xf32>
    %11 = arith.mulf %9, %10 : vector<32x128xf32>
    %12 = arith.addf %6, %11 : vector<32x128xf32>
    %13 = math.cos %12 : vector<32x128xf32>
    %14 = math.sin %12 : vector<32x128xf32>
    %15 = tpu.iota {dimensions = array<i32: 1>} : vector<32x128xi32>
    %c1_i32 = arith.constant 1 : i32
    %16 = vector.broadcast %c1_i32 : i32 to vector<32x128xi32>
    %17 = arith.andi %15, %16 : vector<32x128xi32>
    %c0_i32 = arith.constant 0 : i32
    %18 = vector.broadcast %c0_i32 : i32 to vector<32x128xi32>
    %19 = arith.cmpi eq, %17, %18 : vector<32x128xi32>
    %cst = arith.constant 0.000000e+00 : f32
    %20 = vector.broadcast %cst : f32 to vector<32x128xf32>
    %21 = arith.subf %20, %14 : vector<32x128xf32>
    %22 = arith.select %19, %21, %14 : vector<32x128xi1>, vector<32x128xf32>
    %c0_3 = arith.constant 0 : index
    %c0_4 = arith.constant 0 : index
    %23 = vector.load %arg4[%c0_3, %c0_4] : memref<32x128xf32, #tpu.memory_space<vmem>>, vector<32x128xf32>
    %c127_i32 = arith.constant 127 : i32
    %24 = tpu.dynamic_rotate %23 by %c127_i32 dim 1 : vector<32x128xf32>, i32 -> vector<32x128xf32>
    %c1_i32_5 = arith.constant 1 : i32
    %25 = tpu.dynamic_rotate %23 by %c1_i32_5 dim 1 : vector<32x128xf32>, i32 -> vector<32x128xf32>
    %26 = arith.select %19, %24, %25 : vector<32x128xi1>, vector<32x128xf32>
    %27 = arith.mulf %23, %13 : vector<32x128xf32>
    %28 = arith.mulf %26, %22 : vector<32x128xf32>
    %29 = arith.addf %27, %28 : vector<32x128xf32>
    %c0_6 = arith.constant 0 : index
    %c0_7 = arith.constant 0 : index
    %30 = vector.load %arg6[%c0_6, %c0_7] : memref<32x128xf32, #tpu.memory_space<vmem>>, vector<32x128xf32>
    tpu.vector_store %arg6[%c0_6, %c0_7], %29 {strides = array<i32>} : memref<32x128xf32, #tpu.memory_space<vmem>>, vector<32x128xf32>,
    %c0_8 = arith.constant 0 : index
    %c0_9 = arith.constant 0 : index
    %31 = vector.load %arg2[%c0_8, %c0_9] : memref<32x2xf32, #tpu.memory_space<vmem>>, vector<32x2xf32>
    %c0_10 = arith.constant 0 : index
    %c0_11 = arith.constant 0 : index
    %32 = vector.load %arg3[%c0_10, %c0_11] : memref<2x128xf32, #tpu.memory_space<vmem>>, vector<2x128xf32>
    %33 = vector.extract_strided_slice %31 {offsets = [0, 0], sizes = [32, 1], strides = [1, 1]} : vector<32x2xf32> to vector<32x1xf32>
    %34 = vector.extract_strided_slice %32 {offsets = [0, 0], sizes = [1, 128], strides = [1, 1]} : vector<2x128xf32> to vector<1x128xf32>
    %35 = vector.broadcast %33 : vector<32x1xf32> to vector<32x128xf32>
    %36 = vector.broadcast %34 : vector<1x128xf32> to vector<32x128xf32>
    %37 = arith.mulf %35, %36 : vector<32x128xf32>
    %38 = vector.extract_strided_slice %31 {offsets = [0, 1], sizes = [32, 1], strides = [1, 1]} : vector<32x2xf32> to vector<32x1xf32>
    %39 = vector.extract_strided_slice %32 {offsets = [1, 0], sizes = [1, 128], strides = [1, 1]} : vector<2x128xf32> to vector<1x128xf32>
    %40 = vector.broadcast %38 : vector<32x1xf32> to vector<32x128xf32>
    %41 = vector.broadcast %39 : vector<1x128xf32> to vector<32x128xf32>
    %42 = arith.mulf %40, %41 : vector<32x128xf32>
    %43 = arith.addf %37, %42 : vector<32x128xf32>
    %44 = math.cos %43 : vector<32x128xf32>
    %45 = math.sin %43 : vector<32x128xf32>
    %46 = tpu.iota {dimensions = array<i32: 1>} : vector<32x128xi32>
    %c1_i32_12 = arith.constant 1 : i32
    %47 = vector.broadcast %c1_i32_12 : i32 to vector<32x128xi32>
    %48 = arith.andi %46, %47 : vector<32x128xi32>
    %c0_i32_13 = arith.constant 0 : i32
    %49 = vector.broadcast %c0_i32_13 : i32 to vector<32x128xi32>
    %50 = arith.cmpi eq, %48, %49 : vector<32x128xi32>
    %cst_14 = arith.constant 0.000000e+00 : f32
    %51 = vector.broadcast %cst_14 : f32 to vector<32x128xf32>
    %52 = arith.subf %51, %45 : vector<32x128xf32>
    %53 = arith.select %50, %52, %45 : vector<32x128xi1>, vector<32x128xf32>
    %c0_15 = arith.constant 0 : index
    %c0_16 = arith.constant 0 : index
    %54 = vector.load %arg5[%c0_15, %c0_16] : memref<32x128xf32, #tpu.memory_space<vmem>>, vector<32x128xf32>
    %c127_i32_17 = arith.constant 127 : i32
    %55 = tpu.dynamic_rotate %54 by %c127_i32_17 dim 1 : vector<32x128xf32>, i32 -> vector<32x128xf32>
    %c1_i32_18 = arith.constant 1 : i32
    %56 = tpu.dynamic_rotate %54 by %c1_i32_18 dim 1 : vector<32x128xf32>, i32 -> vector<32x128xf32>
    %57 = arith.select %19, %55, %56 : vector<32x128xi1>, vector<32x128xf32>
    %58 = arith.mulf %54, %44 : vector<32x128xf32>
    %59 = arith.mulf %57, %53 : vector<32x128xf32>
    %60 = arith.addf %58, %59 : vector<32x128xf32>
    %c0_19 = arith.constant 0 : index
    %c0_20 = arith.constant 0 : index
    %61 = vector.load %arg7[%c0_19, %c0_20] : memref<32x128xf32, #tpu.memory_space<vmem>>, vector<32x128xf32>
    tpu.vector_store %arg7[%c0_19, %c0_20], %60 {strides = array<i32>} : memref<32x128xf32, #tpu.memory_space<vmem>>, vector<32x128xf32>,
    return
  }
  func.func @transform_0(%arg0: i32) -> (i32, i32) {
    %c0_i32 = arith.constant 0 : i32
    %c0_i32_0 = arith.constant 0 : i32
    return %arg0, %c0_i32 : i32, i32
  }
  func.func @transform_1(%arg0: i32) -> (i32, i32) {
    %c0_i32 = arith.constant 0 : i32
    %c0_i32_0 = arith.constant 0 : i32
    return %arg0, %c0_i32 : i32, i32
  }
  func.func @transform_2(%arg0: i32) -> (i32, i32) {
    %c0_i32 = arith.constant 0 : i32
    %c0_i32_0 = arith.constant 0 : i32
    %c0_i32_1 = arith.constant 0 : i32
    return %c0_i32, %c0_i32_0 : i32, i32
  }
  func.func @transform_3(%arg0: i32) -> (i32, i32) {
    %c0_i32 = arith.constant 0 : i32
    %c0_i32_0 = arith.constant 0 : i32
    return %arg0, %c0_i32 : i32, i32
  }
  func.func @transform_4(%arg0: i32) -> (i32, i32) {
    %c0_i32 = arith.constant 0 : i32
    %c0_i32_0 = arith.constant 0 : i32
    return %arg0, %c0_i32 : i32, i32
  }
  func.func @transform_5(%arg0: i32) -> (i32, i32) {
    %c0_i32 = arith.constant 0 : i32
    %c0_i32_0 = arith.constant 0 : i32
    return %arg0, %c0_i32 : i32, i32
  }
  func.func @transform_6(%arg0: i32) -> (i32, i32) {
    %c0_i32 = arith.constant 0 : i32
    %c0_i32_0 = arith.constant 0 : i32
    return %arg0, %c0_i32 : i32, i32
  }
}

</mosaic_0001>

<bundles_post_ra>
// kernel: tpu_custom_call.1
= control target key start
LH: loop header
LB: loop body
LE: loop exit
PB: predicated region body
PF: predicated region fallthrough
CT: control target
= control target key end

     0   :  { %12 = vsyncpa [#allocation3], 0  ;;  %v2874_v1 = vmov 1   ;;  %v4489_v2 = vmov 0   ;;  %s4468_s0 = inlined_call_operand.vmem [shape: f32[32,2], index: 0, kind: input, shape index: {}]   ;;  %s4469_s1 = inlined_call_operand.vmem [shape: f32[32,2], index: 1, kind: input, shape index: {}]   ;;  %s4470_s2 = inlined_call_operand.vmem [shape: f32[2,128], index: 2, kind: input, shape index: {}]   ;;  %s4471_s3 = inlined_call_operand.vmem [shape: f32[32,128], index: 3, kind: input, shape index: {}]   ;;  %s4472_s4 = inlined_call_operand.vmem [shape: f32[32,128], index: 4, kind: input, shape index: {}]   ;;  %s4473_s5 = inlined_call_operand.hbm [shape: f32[32,128], index: 5, kind: output, shape index: {0}]   ;;  %s4474_s6 = inlined_call_operand.hbm [shape: f32[32,128], index: 6, kind: output, shape index: {1}]  }
   0x1   :  { %v26_v0 = vld [vmem:[%s4468_s0 + $0x10] sm:$0xff]  ;;  %2806 = vset.pattern.permute.xlu0 %v2874_v1  ;;  %2804 = vset.pattern.permute.xlu1 %v4489_v2  ;;  %v24_v3 = vld [vmem:[%s4468_s0] sm:$0xff] }
   0x2   :  { %63 = vperm.xlu0 %2806, %v26_v0   ;;  %41 = vperm.xlu1 %2804, %v26_v0  }
   0x3   :  { %13 = vsyncpa [#allocation5], 0  ;;  %2805 = vset.pattern.permute.xlu2 %v2874_v1  ;;  %v27_v4 = vld [vmem:[%s4468_s0 + $0x18] sm:$0xff]  ;;  %v25_v5 = vld [vmem:[%s4468_s0 + $0x8] sm:$0xff]  ;;  %s2876_s14 = smov 127   ;;  %s2877_s18 = smov 1  }
   0x4   :  { %55 = vperm.xlu2 %2805, %v24_v3   ;;  %v1367_v6 = vld [vmem:[%s4469_s1] sm:$0xff]  ;;  %v1370_v7 = vld [vmem:[%s4469_s1 + $0x18] sm:$0xff]  ;;  %v1368_v8 = vld [vmem:[%s4469_s1 + $0x8] sm:$0xff]  ;;  %v4487_v43 = vmov 1326507024   ;;  %s2884_s13 = smov [#allocation2]  }
   0x5   :  { %v1369_v9 = vld [vmem:[%s4469_s1 + $0x10] sm:$0xff]  ;;  %v1327_v10 = vld [vmem:[%s4471_s3] sm:$0xff]  ;;  %v1330_v11 = vld [vmem:[%s4471_s3 + $0x18] sm:$0xff]  ;;  %v4499_v46 = vmov 920167782   ;;  %s2712_s1 = sshll.u32 %s4473_s5, 4  ;;  %s2713_s1 = int_to_ptr.hbm [resolvable:$true] %s2712_s1 }
   0x6   :  { %v1328_v12 = vld [vmem:[%s4471_s3 + $0x8] sm:$0xff]  ;;  %v1329_v13 = vld [vmem:[%s4471_s3 + $0x10] sm:$0xff]  ;;  %v2666_v15 = vld [vmem:[%s4472_s4] sm:$0xff]  ;;  %v4482_v51 = vmov 2131351028   ;;  %s2886_s5 = smov 8  }
   0x7   :  { %v2667_v14 = vld [vmem:[%s4472_s4 + $0x8] sm:$0xff]  ;;  %v2668_v16 = vld [vmem:[%s4472_s4 + $0x10] sm:$0xff]  ;;  %v2669_v17 = vld [vmem:[%s4472_s4 + $0x18] sm:$0xff]  ;;  %v4484_v53 = vmov 2102212464   ;;  %s2887_s25 = smov [#allocation4]  }
   0x8   :  { %v28_v18 = vld [vmem:[%s4470_s2] sm:$0x3]  ;;  %v4503_v57 = vmov 2475754826   ;;  %v4479_v0 = vmov 683565275  }
   0x9   :  { %v2986_v19 = vperm.slane %v28_v18, 1  ;;  %v2988_v20 = vperm.slane %v28_v18, 0  ;;  %s2723_s26 = sshll.u32 %s2887_s25, 4  ;;  %s2725_s29 = sshll.u32 %s4474_s6, 4  ;;  %s2724_s26 = int_to_ptr.vmem [resolvable:$true] %s2723_s26  ;;  %s2726_s29 = int_to_ptr.hbm [resolvable:$true] %s2725_s29 }
   0xa   :  { %2807 = vset.pattern.permute.xlu0 %v4489_v2  ;;  %46 = vperm.xlu1 %2804, %v27_v4  }
   0xb   :  { %31 = vperm.xlu0 %2807, %v24_v3  }
   0xc   :  { %59 = vperm.xlu2 %2805, %v25_v5  }
  0x12   :  { %2808 = vset.pattern.permute.xlu1 %v2874_v1 }
  0x13   :  { %67 = vperm.xlu1 %2808, %v27_v4   ;;  %36 = vperm.xlu0 %2807, %v25_v5  }
  0x14   :  { %2809 = vset.pattern.permute.xlu2 %v4489_v2 }
  0x15   :  { %1374 = vperm.xlu2 %2809, %v1367_v6  }
  0x1b   :  { %2810 = vset.pattern.permute.xlu1 %v4489_v2  ;;  %1389 = vperm.xlu0 %2807, %v1370_v7  }
  0x1c   :  { %1379 = vperm.xlu1 %2810, %v1368_v8  }
  0x1d   :  { %1384 = vperm.xlu2 %2809, %v1369_v9  }
  0x23   :  { %1331 = vrot.lane.b32.xlu0 %v1327_v10, %s2876_s14 }
  0x24   :  { %2811 = vset.pattern.permute.xlu1 %v2874_v1  ;;  %2813 = vset.pattern.permute.xlu0 %v2874_v1 }
  0x25   :  { %1398 = vperm.xlu1 %2811, %v1367_v6   ;;  %2812 = vset.pattern.permute.xlu2 %v2874_v1 }
  0x26   :  { %1402 = vperm.xlu2 %2812, %v1368_v8  }
  0x2b   :  { %1337 = vrot.lane.b32.xlu0 %v1330_v11, %s2876_s14 }
  0x2d   :  { %1406 = vperm.xlu1 %2811, %v1369_v9  }
  0x2e   :  { %1410 = vperm.xlu2 %2812, %v1370_v7  }
  0x33   :  { %1343 = vrot.lane.b32.xlu0 %v1329_v13, %s2877_s18 }
  0x35   :  { %1333 = vrot.lane.b32.xlu1 %v1328_v12, %s2876_s14 }
  0x36   :  { %1335 = vrot.lane.b32.xlu2 %v1329_v13, %s2876_s14 }
  0x3b   :  { %2672 = vrot.lane.b32.xlu0 %v2667_v14, %s2876_s14 }
  0x3d   :  { %1339 = vrot.lane.b32.xlu1 %v1327_v10, %s2877_s18 }
  0x3e   :  { %1341 = vrot.lane.b32.xlu2 %v1328_v12, %s2877_s18  ;;  %v3025_v12 = vld [vmem:[%s4470_s2] sm:$0x3] }
  0x43   :  { %2678 = vrot.lane.b32.xlu0 %v2666_v15, %s2877_s18 }
  0x45   :  { %1345 = vrot.lane.b32.xlu1 %v1330_v11, %s2877_s18 }
  0x46   :  { %2670 = vrot.lane.b32.xlu2 %v2666_v15, %s2876_s14 }
  0x4b   :  { %2684 = vrot.lane.b32.xlu0 %v2669_v17, %s2877_s18 }
  0x4d   :  { %2674 = vrot.lane.b32.xlu1 %v2668_v16, %s2876_s14 }
  0x4e   :  { %2676 = vrot.lane.b32.xlu2 %v2669_v17, %s2876_s14  ;;  %s4215_s14 = sshll.u32 %s2884_s13, 4  ;;  %s2711_s14 = int_to_ptr.vmem [resolvable:$true] %s4215_s14 }
  0x55   :  { %2680 = vrot.lane.b32.xlu1 %v2667_v14, %s2877_s18 }
  0x56   :  { %2682 = vrot.lane.b32.xlu2 %v2668_v16, %s2877_s18 }
  0x5e   :  { %v56_v28 = vpop.permute.xlu2 %55 }
  0x5f   :  { %v71_v31 = vmul.f32 %v2986_v19, %v56_v28 }
  0x66   :  { %v60_v48 = vpop.permute.xlu2 %59 }
  0x74   :  { %v64_v21 = vpop.permute.xlu0 %63  ;;  %v42_v22 = vpop.permute.xlu1 %41 }
  0x75   :  { %v73_v23 = vmul.f32 %v2986_v19, %v64_v21  ;;  %v52_v24 = vmul.f32 %v2988_v20, %v42_v22  ;;  %v3041_v22 = vperm.slane %v3025_v12, 0 }
  0x77   :  { %v2992_v25 = vadd.f32 %v73_v23, %v52_v24  ;;  %v1375_v23 = vpop.permute.xlu2 %1374 }
  0x79   :  { %4550 = vst [vmem:[#allocation8_spill] sm:$0xff] %v2992_v25  ;;  %v390_v26 = vand.u32 2139095040, %v2992_v25  ;;  %v4477_v45 = vand.u32 2147483647, %v2992_v25 }
  0x7b   :  { %v391_v27 = vshrl.u32 %v390_v26, 23  ;;  %v394_v60 = vand.u32 8388607, %v4477_v45 }
  0x7c   :  { %v47_v39 = vpop.permute.xlu1 %46 }
  0x7d   :  { %v2748_v29 = vadd.s32 4294967169, %v391_v27  ;;  %v32_v30 = vpop.permute.xlu0 %31  ;;  %v53_v9 = vmul.f32 %v2988_v20, %v47_v39  ;;  %v395_v10 = vor.u32 8388608, %v394_v60 }
  0x7e   :  { %v50_v32 = vmul.f32 %v2988_v20, %v32_v30  ;;  %v72_v30 = vmul.f32 %v2986_v19, %v60_v48 }
  0x7f   :  { %v397_v33 = vadd.s32 1, %v2748_v29  ;;  %v3044_v24 = vshll.u32 %v395_v10, 8 }
  0x80   :  { %v2997_v34 = vadd.f32 %v71_v31, %v50_v32 }
  0x81   :  { %vm398_vm0 = vcmp.gt.s32.totalorder %v397_v33, 0  ;;  %v3066_v39 = vshrl.u32 %v3044_v24, 16 }
  0x82   :  { %4551 = vst [vmem:[#allocation9_spill] sm:$0xff] %v2997_v34  ;;  %v82_v35 = vand.u32 2139095040, %v2997_v34  ;;  %v399_v36 = vsel %vm398_vm0, %v397_v33, 0  ;;  %v4476_v14 = vand.u32 2147483647, %v2997_v34 }
  0x83   :  { %v401_v38 = vand.u32 31, %v399_v36  ;;  %v3003_v49 = vshrl.u32 %v399_v36, 5 }
  0x84   :  { %v83_v37 = vshrl.u32 %v82_v35, 23  ;;  %v86_v28 = vand.u32 8388607, %v4476_v14  ;;  %v3062_v35 = vmul.f32 %v3041_v22, %v1375_v23 }
  0x85   :  { %v402_v41 = vsub.s32 32, %v401_v38  ;;  %v416_v50 = vshll.u32 %v4499_v46, %v401_v38  ;;  %v413_v55 = vshll.u32 %v4484_v53, %v401_v38  ;;  %v68_v56 = vpop.permute.xlu1 %67  ;;  %v407_v61 = vshll.u32 %v4503_v57, %v401_v38 }
  0x86   :  { %v2742_v40 = vadd.s32 4294967169, %v83_v37  ;;  %v410_v62 = vshll.u32 %v4482_v51, %v401_v38  ;;  %v404_v1 = vshll.u32 %v4479_v0, %v401_v38  ;;  %v74_v4 = vmul.f32 %v2986_v19, %v68_v56  ;;  %v37_v37 = vpop.permute.xlu0 %36 }
  0x87   :  { %v417_v44 = vshrl.u32 %v4487_v43, %v402_v41  ;;  %v414_v47 = vshrl.u32 %v4499_v46, %v402_v41  ;;  %v408_v52 = vshrl.u32 %v4482_v51, %v402_v41  ;;  %v411_v54 = vshrl.u32 %v4484_v53, %v402_v41 }
  0x88   :  { %v89_v42 = vadd.s32 1, %v2742_v40  ;;  %v405_v58 = vshrl.u32 %v4503_v57, %v402_v41  ;;  %vm422_vm2 = vcmp.lt.s32.totalorder %v3003_v49, 4  ;;  %vm419_vm3 = vcmp.lt.s32.totalorder %v3003_v49, 1 }
  0x89   :  { %v418_v59 = vor.u32 %v417_v44, %v416_v50  ;;  %v415_v63 = vor.u32 %v414_v47, %v413_v55  ;;  %v409_v5 = vor.u32 %v408_v52, %v407_v61  ;;  %v412_v6 = vor.u32 %v411_v54, %v410_v62 }
  0x8a   :  { %vm90_vm1 = vcmp.gt.s32.totalorder %v89_v42, 0  ;;  %v406_v7 = vor.u32 %v405_v58, %v404_v1  ;;  %vm421_vm4 = vcmp.lt.s32.totalorder %v3003_v49, 3  ;;  %v3030_v15 = vadd.f32 %v74_v4, %v53_v9 }
  0x8b   :  { %v91_v3 = vsel %vm90_vm1, %v89_v42, 0  ;;  %v432_v8 = vsel %vm422_vm2, %v418_v59, 1326507024  ;;  %v428_v11 = vsel %vm422_vm2, %v415_v63, 920167782  ;;  %v431_v16 = vsel %vm419_vm3, %v409_v5, %v412_v6 }
  0x8c   :  { %v93_v13 = vand.u32 31, %v91_v3  ;;  %4552 = vst [vmem:[#allocation10_spill] sm:$0xff] %v3030_v15  ;;  %v433_v17 = vsel %vm421_vm4, %v415_v63, %v432_v8  ;;  %v427_v18 = vsel %vm419_vm3, %v406_v7, %v409_v5  ;;  %v429_v21 = vsel %vm421_vm4, %v412_v6, %v428_v11 }
  0x8d   :  { %vm420_vm5 = vcmp.lt.s32.totalorder %v3003_v49, 2  ;;  %v544_v29 = vand.u32 2139095040, %v3030_v15  ;;  %v403_v32 = vshrl.u32 %v4479_v0, %v402_v41  ;;  %v424_v33 = vsel %vm422_vm2, %v412_v6, 2102212464 }
  0x8e   :  { %v94_v26 = vsub.s32 32, %v93_v13  ;;  %v3048_v27 = vsel %vm420_vm5, %v431_v16, %v433_v17  ;;  %v3056_v31 = vsel %vm420_vm5, %v427_v18, %v429_v21  ;;  %v436_v38 = vand.u32 65535, %v3044_v24  ;;  %v1390_v14 = vpop.permute.xlu0 %1389 }
  0x8f   :  { %v545_v36 = vshrl.u32 %v544_v29, 23  ;;  %v439_v19 = vshrl.u32 %v3048_v27, 16  ;;  %v423_v41 = vsel %vm419_vm3, %v403_v32, %v406_v7  ;;  %v461_v42 = vshrl.u32 %v3056_v31, 16 }
  0x90   :  { %v109_v40 = vshrl.u32 %v4487_v43, %v94_v26  ;;  %v87_v44 = vor.u32 8388608, %v86_v28  ;;  %v425_v48 = vsel %vm421_vm4, %v409_v5, %v424_v33  ;;  %v106_v50 = vshrl.u32 %v4499_v46, %v94_v26  ;;  %v1385_v5 = vpop.permute.xlu2 %1384 }
  0x91   :  { %v2751_v47 = vadd.s32 4294967169, %v545_v36  ;;  %v108_v52 = vshll.u32 %v4499_v46, %v93_v13  ;;  %v51_v54 = vmul.f32 %v2988_v20, %v37_v37  ;;  %v438_v55 = vand.u32 65535, %v3048_v27 }
  0x92   :  { %v92_v56 = vshrl.u32 %v91_v3, 5  ;;  %v100_v58 = vshrl.u32 %v4482_v51, %v94_v26  ;;  %v103_v59 = vshrl.u32 %v4484_v53, %v94_v26  ;;  %v3083_v60 = vmul.u32 %v439_v19, %v436_v38 }
  0x93   :  { %v105_v61 = vshll.u32 %v4484_v53, %v93_v13  ;;  %v110_v62 = vor.u32 %v109_v40, %v108_v52  ;;  %v551_v63 = vadd.s32 1, %v2751_v47  ;;  %v3088_v1 = vmul.u32 %v461_v42, %v436_v38 }
  0x94   :  { %v97_v20 = vshrl.u32 %v4503_v57, %v94_v26  ;;  %v99_v3 = vshll.u32 %v4503_v57, %v93_v13  ;;  %v102_v4 = vshll.u32 %v4482_v51, %v93_v13  ;;  %v460_v6 = vand.u32 65535, %v3056_v31 }
  0x95   :  { %v107_v7 = vor.u32 %v106_v50, %v105_v61  ;;  %vm552_vm6 = vcmp.gt.s32.totalorder %v551_v63, 0  ;;  %v3094_v8 = vadd.f32 %v72_v30, %v51_v54  ;;  %v96_v9 = vshll.u32 %v4479_v0, %v93_v13 }
  0x96   :  { %v101_v10 = vor.u32 %v100_v58, %v99_v3  ;;  %v104_v11 = vor.u32 %v103_v59, %v102_v4  ;;  %vm114_vm7 = vcmp.lt.s32.totalorder %v92_v56, 4  ;;  %v3099_v16 = vsel %vm420_vm5, %v423_v41, %v425_v48 }
  0x97   :  { %4553 = vst [vmem:[#allocation11_spill] sm:$0xff] %v3094_v8  ;;  %v444_v17 = vshll.u32 %v3083_v60, 16  ;;  %v124_v18 = vsel %vm114_vm7, %v110_v62, 1326507024  ;;  %v3102_v21 = vshll.u32 %v87_v44, 8  ;;  %v440_v23 = vmul.u32 %v438_v55, %v436_v38 }
  0x98   :  { %v4478_v28 = vshll.u32 %v3088_v1, 16  ;;  %v98_v29 = vor.u32 %v97_v20, %v96_v9  ;;  %v553_v30 = vsel %vm552_vm6, %v551_v63, 0  ;;  %vm111_vm8 = vcmp.lt.s32.totalorder %v92_v56, 1  ;;  %v3139_v20 = vpop.permute.xlu2 %1402 }
  0x99   :  { %4554 = vst [vmem:[#allocation12_spill] sm:$0xff] %v3102_v21  ;;  %vm113_vm9 = vcmp.lt.s32.totalorder %v92_v56, 3  ;;  %v120_v13 = vsel %vm114_vm7, %v107_v7, 920167782  ;;  %v236_v32 = vand.u32 2139095040, %v3094_v8  ;;  %v3106_v33 = vmul.u32 %v460_v6, %v436_v38 }
  0x9a   :  { %v116_v49 = vsel %vm114_vm7, %v104_v11, 2102212464  ;;  %v123_v36 = vsel %vm111_vm8, %v101_v10, %v104_v11  ;;  %v125_v37 = vsel %vm113_vm9, %v107_v7, %v124_v18  ;;  %vm3110_vm10 = vc.u32 %v440_v23, %v444_v17 }
  0x9b   :  { %v95_v41 = vshrl.u32 %v4479_v0, %v94_v26  ;;  %v4475_v44 = vand.u32 2147483647, %v3030_v15  ;;  %v555_v47 = vand.u32 31, %v553_v30  ;;  %vm3119_vm11 = vc.u32 %v3106_v33, %v4478_v28 }
  0x9c   :  { %vm112_vm12 = vcmp.lt.s32.totalorder %v92_v56, 2  ;;  %v119_v48 = vsel %vm111_vm8, %v98_v29, %v101_v10  ;;  %v121_v50 = vsel %vm113_vm9, %v104_v11, %v120_v13  ;;  %v117_v54 = vsel %vm113_vm9, %v101_v10, %v116_v49 }
  0x9d   :  { %v115_v52 = vsel %vm111_vm8, %v95_v41, %v98_v29  ;;  %v3128_v26 = vsel %vm112_vm12, %v123_v36, %v125_v37  ;;  %v237_v58 = vshrl.u32 %v236_v32, 23  ;;  %v3131_v59 = vmul.u32 %v438_v55, %v3066_v39 }
  0x9e   :  { %v128_v62 = vand.u32 65535, %v3102_v21  ;;  %v3137_v63 = vmul.f32 %v3041_v22, %v1385_v5  ;;  %v443_v3 = vmul.u32 %v439_v19, %v3066_v39  ;;  %v3145_v4 = vsel %vm112_vm12, %v119_v48, %v121_v50 }
  0x9f   :  { %v3148_v55 = vshrl.u32 %v3102_v21, 16  ;;  %v556_v7 = vsub.s32 32, %v555_v47  ;;  %v449_v9 = vsel %vm3110_vm10, 1, %v4489_v2  ;;  %v471_v5 = vsel %vm3119_vm11, 1, %v4489_v2 }
  0xa0   :  { %v3157_v10 = vsel %vm112_vm12, %v115_v52, %v117_v54  ;;  %v131_v27 = vshrl.u32 %v3128_v26, 16  ;;  %v3161_v19 = vmul.u32 %v460_v6, %v3066_v39  ;;  %v465_v11 = vmul.u32 %v461_v42, %v3066_v39 }
  0xa1   :  { %4559 = vst [vmem:[#allocation13_spill] sm:$0xff] %v3157_v10  ;;  %v3168_v18 = vand.u32 8388607, %v4475_v44  ;;  %v2745_v29 = vadd.s32 4294967169, %v237_v58  ;;  %v3171_v32 = vadd.s32 %v444_v17, %v440_v23  ;;  %v153_v49 = vshrl.u32 %v3145_v4, 16 }
  0xa2   :  { %v3175_v36 = vadd.s32 %v449_v9, %v443_v3  ;;  %v3177_v6 = vadd.s32 %v471_v5, %v465_v11  ;;  %v571_v39 = vshrl.u32 %v4487_v43, %v556_v7  ;;  %v130_v42 = vand.u32 65535, %v3128_v26 }
  0xa3   :  { %v3185_v37 = vmul.u32 %v131_v27, %v128_v62  ;;  %v152_v17 = vand.u32 65535, %v3145_v4  ;;  %v565_v23 = vshrl.u32 %v4484_v53, %v556_v7  ;;  %v549_v40 = vor.u32 8388608, %v3168_v18 }
  0xa4   :  { %v568_v41 = vshrl.u32 %v4499_v46, %v556_v7  ;;  %v570_v38 = vshll.u32 %v4499_v46, %v555_v47  ;;  %v243_v48 = vadd.s32 1, %v2745_v29  ;;  %v3192_v50 = vmul.u32 %v153_v49, %v128_v62 }
  0xa5   :  { %4560 = vst [vmem:[#allocation14_spill] sm:$0xff] %v3185_v37  ;;  %v554_v52 = vshrl.u32 %v553_v30, 5  ;;  %v562_v54 = vshrl.u32 %v4482_v51, %v556_v7  ;;  %v564_v58 = vshll.u32 %v4482_v51, %v555_v47  ;;  %v559_v3 = vshrl.u32 %v4503_v57, %v556_v7  ;;  %v1411_v30 = vpop.permute.xlu2 %1410 }
  0xa6   :  { %v567_v4 = vshll.u32 %v4484_v53, %v555_v47  ;;  %v572_v9 = vor.u32 %v571_v39, %v570_v38  ;;  %v3199_v5 = vperm.slane %v3025_v12, 1  ;;  %v132_v11 = vmul.u32 %v130_v42, %v128_v62 }
  0xa7   :  { %v136_v18 = vshll.u32 %v3185_v37, 16  ;;  %v561_v29 = vshll.u32 %v4503_v57, %v555_v47  ;;  %v566_v44 = vor.u32 %v565_v23, %v564_v58  ;;  %v3204_v45 = vmul.u32 %v130_v42, %v3148_v55 }
  0xa8   :  { %v558_v31 = vshll.u32 %v4479_v0, %v555_v47  ;;  %v569_v61 = vor.u32 %v568_v41, %v567_v4  ;;  %vm244_vm13 = vcmp.gt.s32.totalorder %v243_v48, 0  ;;  %v4481_v39 = vshll.u32 %v3192_v50, 16 }
  0xa9   :  { %v563_v38 = vor.u32 %v562_v54, %v561_v29  ;;  %vm576_vm14 = vcmp.lt.s32.totalorder %v554_v52, 4  ;;  %v4486_v12 = vand.u32 2147483647, %v3094_v8  ;;  %v1396_v13 = vmul.f32 %v3041_v22, %v1390_v14 }
  0xaa   :  { %v560_v56 = vor.u32 %v559_v3, %v558_v31  ;;  %v586_v28 = vsel %vm576_vm14, %v572_v9, 1326507024  ;;  %v1417_v23 = vmul.f32 %v3199_v5, %v1411_v30  ;;  %vm3211_vm15 = vc.u32 %v132_v11, %v136_v18 }
  0xab   :  { %v3215_v42 = vmul.u32 %v152_v17, %v128_v62  ;;  %v578_v47 = vsel %vm576_vm14, %v566_v44, 2102212464  ;;  %v245_v41 = vsel %vm244_vm13, %v243_v48, 0  ;;  %v557_v4 = vshrl.u32 %v4479_v0, %v556_v7 }
  0xac   :  { %vm573_vm0 = vcmp.lt.s32.totalorder %v554_v52, 1  ;;  %vm575_vm1 = vcmp.lt.s32.totalorder %v554_v52, 3  ;;  %v582_v54 = vsel %vm576_vm14, %v569_v61, 920167782  ;;  %v240_v62 = vand.u32 8388607, %v4486_v12 }
  0xad   :  { %vm3221_vm2 = vc.u32 %v3215_v42, %v4481_v39  ;;  %v585_v31 = vsel %vm573_vm0, %v563_v38, %v566_v44  ;;  %v587_v3 = vsel %vm575_vm1, %v569_v61, %v586_v28  ;;  %v577_v9 = vsel %vm573_vm0, %v557_v4, %v560_v56 }
  0xae   :  { %v579_v29 = vsel %vm575_vm1, %v563_v38, %v578_v47  ;;  %v247_v48 = vand.u32 31, %v245_v41  ;;  %v3227_v30 = vadd.f32 %v1417_v23, %v1396_v13  ;;  %v135_v7 = vmul.u32 %v131_v27, %v3148_v55  ;;  %v1380_v23 = vpop.permute.xlu1 %1379 }
  0xaf   :  { %vm574_vm3 = vcmp.lt.s32.totalorder %v554_v52, 2  ;;  %v581_v0 = vsel %vm573_vm0, %v560_v56, %v563_v38  ;;  %v583_v39 = vsel %vm575_vm1, %v566_v44, %v582_v54  ;;  %v3233_v51 = vmul.u32 %v152_v17, %v3148_v55 }
  0xb0   :  { %4565 = vst [vmem:[#allocation15_spill] sm:$0xff] %v3227_v30  ;;  %v157_v28 = vmul.u32 %v153_v49, %v3148_v55  ;;  %v588_v61 = vsel %vm574_vm3, %v585_v31, %v587_v3  ;;  %v3236_v53 = vshll.u32 %v549_v40, 8  ;;  %v141_v13 = vsel %vm3211_vm15, 1, %v4489_v2 }
  0xb1   :  { %v163_v26 = vsel %vm3221_vm2, 1, %v4489_v2  ;;  %v3245_v27 = vsel %vm574_vm3, %v577_v9, %v579_v29  ;;  %v584_v44 = vsel %vm574_vm3, %v581_v0, %v583_v39  ;;  %v241_v56 = vor.u32 8388608, %v240_v62 }
  0xb2   :  { %4566 = vst [vmem:[#allocation16_spill] sm:$0xff] %v3236_v53  ;;  %v3247_v17 = vsub.s32 32, %v247_v48  ;;  %v1887_v55 = vand.u32 2139095040, %v3227_v30  ;;  %v592_v40 = vand.u32 65535, %v588_v61  ;;  %v593_v52 = vshrl.u32 %v588_v61, 16 }
  0xb3   :  { %4567 = vst [vmem:[#allocation17_spill] sm:$0xff] %v3245_v27  ;;  %v1415_v38 = vmul.f32 %v3199_v5, %v3139_v20  ;;  %v3253_v58 = vadd.s32 %v136_v18, %v132_v11  ;;  %v590_v4 = vand.u32 65535, %v3236_v53  ;;  %v591_v54 = vshrl.u32 %v3236_v53, 16 }
  0xb4   :  { %v1888_v0 = vshrl.u32 %v1887_v55, 23  ;;  %v3257_v39 = vadd.s32 %v141_v13, %v135_v7  ;;  %v3259_v14 = vadd.s32 %v163_v26, %v157_v28  ;;  %v614_v31 = vand.u32 65535, %v584_v44 }
  0xb5   :  { %v615_v62 = vshrl.u32 %v584_v44, 16  ;;  %v260_v20 = vshrl.u32 %v4499_v46, %v3247_v17  ;;  %v3265_v9 = vshll.u32 %v241_v56, 8  ;;  %v1394_v11 = vmul.f32 %v3041_v22, %v1380_v23 }
  0xb6   :  { %4568 = vst [vmem:[#allocation18_spill] sm:$0xff] %v3259_v14  ;;  %v594_v18 = vmul.u32 %v592_v40, %v590_v4  ;;  %v3268_v29 = vmul.u32 %v593_v52, %v590_v4  ;;  %v263_v7 = vshrl.u32 %v4487_v43, %v3247_v17  ;;  %v2775_v28 = vadd.s32 4294967169, %v1888_v0 }
  0xb7   :  { %4569 = vst [vmem:[#allocation19_spill] sm:$0xff] %v3265_v9  ;;  %v3272_v61 = vmul.u32 %v592_v40, %v591_v54  ;;  %v3274_v13 = vshrl.u32 %v245_v41, 5  ;;  %v251_v26 = vshrl.u32 %v4503_v57, %v3247_v17  ;;  %v4572_v44 = vmov 2102212464  }
  0xb8   :  { %4570 = vst [vmem:[#allocation20_spill] sm:$0xff] %v3268_v29  ;;  %v259_v55 = vshll.u32 %v4572_v44, %v247_v48  ;;  %v4573_v56 = vmov 2131351028   ;;  %v257_v22 = vshrl.u32 %v4572_v44, %v3247_v17  ;;  %v262_v23 = vshll.u32 %v4499_v46, %v247_v48 }
  0xb9   :  { %4571 = vst [vmem:[#allocation21_spill] sm:$0xff] %v3272_v61  ;;  %v254_v12 = vshrl.u32 %v4573_v56, %v3247_v17  ;;  %v1894_v3 = vadd.s32 1, %v2775_v28  ;;  %v597_v49 = vmul.u32 %v593_v52, %v591_v54  ;;  %v3284_v0 = vmul.u32 %v615_v62, %v590_v4 }
  0xba   :  { %v4575_v40 = vmov 683565275   ;;  %v261_v47 = vor.u32 %v260_v20, %v259_v55  ;;  %v253_v43 = vshll.u32 %v4503_v57, %v247_v48  ;;  %v256_v2 = vshll.u32 %v4573_v56, %v247_v48 }
  0xbb   :  { %4574 = vst [vmem:[#allocation22_spill] sm:$0xff] %v3284_v0  ;;  %v250_v41 = vshll.u32 %v4575_v40, %v247_v48  ;;  %v264_v15 = vor.u32 %v263_v7, %v262_v23  ;;  %vm1895_vm4 = vcmp.gt.s32.totalorder %v1894_v3, 0  ;;  %v598_v27 = vshll.u32 %v3268_v29, 16 }
  0xbc   :  { %v1896_v8 = vsel %vm1895_vm4, %v1894_v3, 0  ;;  %v3290_v34 = vadd.f32 %v1415_v38, %v1394_v11  ;;  %v255_v46 = vor.u32 %v254_v12, %v253_v43  ;;  %v258_v28 = vor.u32 %v257_v22, %v256_v2 }
  0xbd   :  { %v252_v53 = vor.u32 %v251_v26, %v250_v41  ;;  %vm268_vm5 = vcmp.lt.s32.totalorder %v3274_v13, 4  ;;  %v1898_v52 = vand.u32 31, %v1896_v8  ;;  %v3293_v25 = vmul.u32 %v614_v31, %v590_v4 }
  0xbe   :  { %4576 = vst [vmem:[#allocation23_spill] sm:$0xff] %v3290_v34  ;;  %v3295_v20 = vmul.u32 %v614_v31, %v591_v54  ;;  %v3297_v55 = vmul.u32 %v615_v62, %v591_v54  ;;  %v274_v48 = vsel %vm268_vm5, %v261_v47, 920167782  ;;  %v4509_v3 = vshll.u32 %v3284_v0, 16 }
  0xbf   :  { %4577 = vst [vmem:[#allocation24_spill] sm:$0xff] %v3293_v25  ;;  %v278_v43 = vsel %vm268_vm5, %v264_v15, 1326507024  ;;  %v3305_v2 = vsub.s32 32, %v1898_v52  ;;  %vm602_vm6 = vc.u32 %v594_v18, %v598_v27  ;;  %vm265_vm7 = vcmp.lt.s32.totalorder %v3274_v13, 1 }
  0xc0   :  { %4578 = vst [vmem:[#allocation25_spill] sm:$0xff] %v3295_v20  ;;  %vm267_vm8 = vcmp.lt.s32.totalorder %v3274_v13, 3  ;;  %v1579_v12 = vand.u32 2139095040, %v3290_v34  ;;  %v273_v4 = vsel %vm265_vm7, %v252_v53, %v255_v46  ;;  %v3316_v31 = vand.u32 65535, %v3265_v9 }
  0xc1   :  { %v275_v54 = vsel %vm267_vm8, %v258_v28, %v274_v48  ;;  %v3318_v15 = vadd.s32 %v598_v27, %v594_v18  ;;  %v277_v62 = vsel %vm265_vm7, %v255_v46, %v258_v28  ;;  %v279_v11 = vsel %vm267_vm8, %v261_v47, %v278_v43  ;;  %v1399_v43 = vpop.permute.xlu1 %1398 }
  0xc2   :  { %v3325_v26 = vshrl.u32 %v3265_v9, 16  ;;  %v4580_v22 = vmov 0   ;;  %vm266_vm9 = vcmp.lt.s32.totalorder %v3274_v13, 2  ;;  %v4581_v41 = vmov 920167782  }
  0xc3   :  { %4579 = vst [vmem:[#allocation26_spill] sm:$0xff] %v3318_v15  ;;  %v603_v23 = vsel %vm602_vm6, 1, %v4580_v22  ;;  %v1913_v48 = vshll.u32 %v4581_v41, %v1898_v52  ;;  %v4582_v38 = vmov 1326507024   ;;  %vm624_vm10 = vc.u32 %v3293_v25, %v4509_v3 }
  0xc4   :  { %v1914_v7 = vshrl.u32 %v4582_v38, %v3305_v2  ;;  %v3337_v27 = vsel %vm266_vm9, %v273_v4, %v275_v54  ;;  %v1580_v18 = vshrl.u32 %v1579_v12, 23  ;;  %v3342_v57 = vsel %vm266_vm9, %v277_v62, %v279_v11 }
  0xc5   :  { %v3344_v20 = vshrl.u32 %v1896_v8, 5  ;;  %v4583_v29 = vmov 2475754826   ;;  %v1907_v0 = vshll.u32 %v4573_v56, %v1898_v52  ;;  %v1905_v3 = vshrl.u32 %v4573_v56, %v3305_v2 }
  0xc6   :  { %v1904_v15 = vshll.u32 %v4583_v29, %v1898_v52  ;;  %v1908_v4 = vshrl.u32 %v4572_v44, %v3305_v2  ;;  %v1910_v54 = vshll.u32 %v4572_v44, %v1898_v52  ;;  %v1911_v12 = vshrl.u32 %v4581_v41, %v3305_v2 }
  0xc7   :  { %v3355_v47 = vadd.s32 %v603_v23, %v597_v49  ;;  %v625_v8 = vsel %vm624_vm10, 1, %v4580_v22  ;;  %v1915_v62 = vor.u32 %v1914_v7, %v1913_v48  ;;  %v1414_v11 = vmul.f32 %v3199_v5, %v1399_v43 }
  0xc8   :  { %v249_v25 = vshrl.u32 %v4575_v40, %v3247_v17  ;;  %v270_v61 = vsel %vm268_vm5, %v258_v28, 2102212464  ;;  %v307_v10 = vshrl.u32 %v3337_v27, 16  ;;  %v2769_v21 = vadd.s32 4294967169, %v1580_v18 }
  0xc9   :  { %4584 = vst [vmem:[#allocation27_spill] sm:$0xff] %v3355_v47  ;;  %v285_v14 = vshrl.u32 %v3342_v57, 16  ;;  %v4585_v37 = vand.u32 2147483647, %v3227_v30  ;;  %v1901_v23 = vshll.u32 %v4575_v40, %v1898_v52  ;;  %v1902_v7 = vshrl.u32 %v4583_v29, %v3305_v2 }
  0xca   :  { %v1906_v48 = vor.u32 %v1905_v3, %v1904_v15  ;;  %v1909_v43 = vor.u32 %v1908_v4, %v1907_v0  ;;  %v1912_v47 = vor.u32 %v1911_v12, %v1910_v54  ;;  %vm1919_vm11 = vcmp.lt.s32.totalorder %v3344_v20, 4 }
  0xcb   :  { %v1891_v49 = vand.u32 8388607, %v4585_v37  ;;  %v269_v17 = vsel %vm265_vm7, %v249_v25, %v252_v53  ;;  %v271_v28 = vsel %vm267_vm8, %v255_v46, %v270_v61  ;;  %v1929_v18 = vsel %vm1919_vm11, %v1915_v62, 1326507024 }
  0xcc   :  { %v3378_v37 = vadd.f32 %v1414_v11, %v3062_v35  ;;  %v306_v52 = vand.u32 65535, %v3337_v27  ;;  %v3382_v3 = vmul.u32 %v307_v10, %v3316_v31  ;;  %v4516_v0 = vand.u32 2147483647, %v3290_v34 }
  0xcd   :  { %v1586_v15 = vadd.s32 1, %v2769_v21  ;;  %v3386_v4 = vmul.u32 %v285_v14, %v3316_v31  ;;  %v1903_v25 = vor.u32 %v1902_v7, %v1901_v23  ;;  %vm1916_vm12 = vcmp.lt.s32.totalorder %v3344_v20, 1 }
  0xce   :  { %4586 = vst [vmem:[#allocation28_spill] sm:$0xff] %v3378_v37  ;;  %vm1918_vm13 = vcmp.lt.s32.totalorder %v3344_v20, 3  ;;  %v1892_v46 = vor.u32 8388608, %v1891_v49  ;;  %v1925_v53 = vsel %vm1919_vm11, %v1912_v47, 920167782  ;;  %v1928_v35 = vsel %vm1916_vm12, %v1906_v48, %v1909_v43 }
  0xcf   :  { %4587 = vst [vmem:[#allocation29_spill] sm:$0xff] %v3382_v3  ;;  %v1930_v61 = vsel %vm1918_vm13, %v1912_v47, %v1929_v18  ;;  %v3397_v21 = vadd.s32 %v625_v8, %v3297_v55  ;;  %v3401_v27 = vsel %vm266_vm9, %v269_v17, %v271_v28  ;;  %v284_v54 = vand.u32 65535, %v3342_v57 }
  0xd0   :  { %4588 = vst [vmem:[#allocation30_spill] sm:$0xff] %v3386_v4  ;;  %v1425_v12 = vand.u32 2139095040, %v3378_v37  ;;  %v4517_v62 = vshll.u32 %v3382_v3, 16  ;;  %vm1917_vm14 = vcmp.lt.s32.totalorder %v3344_v20, 2  ;;  %v1583_v11 = vand.u32 8388607, %v4516_v0 }
  0xd1   :  { %4589 = vst [vmem:[#allocation31_spill] sm:$0xff] %v3397_v21  ;;  %vm1587_vm15 = vcmp.gt.s32.totalorder %v1586_v15, 0  ;;  %v290_v47 = vshll.u32 %v3386_v4, 16  ;;  %v1924_v55 = vsel %vm1916_vm12, %v1903_v25, %v1906_v48  ;;  %v1926_v13 = vsel %vm1918_vm13, %v1909_v43, %v1925_v53 }
  0xd2   :  { %4590 = vst [vmem:[#allocation32_spill] sm:$0xff] %v3401_v27  ;;  %v1931_v57 = vsel %vm1917_vm14, %v1928_v35, %v1930_v61  ;;  %v3417_v8 = vmul.u32 %v306_v52, %v3316_v31  ;;  %v1900_v23 = vshrl.u32 %v4575_v40, %v3305_v2  ;;  %v3423_v7 = vshll.u32 %v1892_v46, 8 }
  0xd3   :  { %v286_v17 = vmul.u32 %v284_v54, %v3316_v31  ;;  %v1921_v28 = vsel %vm1919_vm11, %v1909_v43, 2102212464  ;;  %v1588_v18 = vsel %vm1587_vm15, %v1586_v15, 0  ;;  %v1426_v53 = vshrl.u32 %v1425_v12, 23 }
  0xd4   :  { %4591 = vst [vmem:[#allocation33_spill] sm:$0xff] %v3417_v8  ;;  %vm316_vm0 = vc.u32 %v3417_v8, %v4517_v62  ;;  %v1927_v35 = vsel %vm1917_vm14, %v1924_v55, %v1926_v13  ;;  %v1936_v61 = vshrl.u32 %v1931_v57, 16  ;;  %v1584_v0 = vor.u32 8388608, %v1583_v11 }
  0xd5   :  { %4592 = vst [vmem:[#allocation34_spill] sm:$0xff] %v3423_v7  ;;  %v3434_v2 = vmul.u32 %v284_v54, %v3325_v26  ;;  %vm294_vm1 = vc.u32 %v286_v17, %v290_v47  ;;  %v3437_v31 = vmul.u32 %v306_v52, %v3325_v26  ;;  %v311_v43 = vmul.u32 %v307_v10, %v3325_v26 }
  0xd6   :  { %v1920_v15 = vsel %vm1916_vm12, %v1900_v23, %v1903_v25  ;;  %v1922_v46 = vsel %vm1918_vm13, %v1906_v48, %v1921_v28  ;;  %v1933_v12 = vand.u32 65535, %v3423_v7  ;;  %v1590_v55 = vand.u32 31, %v1588_v18 }
  0xd7   :  { %4593 = vst [vmem:[#allocation35_spill] sm:$0xff] %v3437_v31  ;;  %v289_v11 = vmul.u32 %v285_v14, %v3325_v26  ;;  %v317_v54 = vsel %vm316_vm0, 1, %v4580_v22  ;;  %v1958_v13 = vshrl.u32 %v1927_v35, 16  ;;  %v2766_v49 = vadd.s32 4294967169, %v1426_v53 }
  0xd8   :  { %v295_v52 = vsel %vm294_vm1, 1, %v4580_v22  ;;  %v3449_v10 = vmul.u32 %v1936_v61, %v1933_v12  ;;  %v3451_v34 = vshll.u32 %v1584_v0, 8  ;;  %v3456_v48 = vsel %vm1917_vm14, %v1920_v15, %v1922_v46 }
  0xd9   :  { %4596 = vst [vmem:[#allocation38_spill] sm:$0xff] %v3456_v48  ;;  %v1935_v23 = vand.u32 65535, %v1931_v57  ;;  %v1432_v14 = vadd.s32 1, %v2766_v49  ;;  %v3458_v26 = vadd.s32 %v290_v47, %v286_v17  ;;  %v3460_v28 = vadd.s32 %v317_v54, %v311_v43 }
  0xda   :  { %4594 = vst [vmem:[#allocation36_spill] sm:$0xff] %v3449_v10  ;;  %v1957_v53 = vand.u32 65535, %v1927_v35  ;;  %v1591_v30 = vsub.s32 32, %v1590_v55  ;;  %v3462_v21 = vadd.s32 %v295_v52, %v289_v11  ;;  %v1934_v62 = vshrl.u32 %v3423_v7, 16 }
  0xdb   :  { %4595 = vst [vmem:[#allocation37_spill] sm:$0xff] %v3451_v34  ;;  %v3465_v0 = vmul.u32 %v1958_v13, %v1933_v12  ;;  %vm1433_vm2 = vcmp.gt.s32.totalorder %v1432_v14, 0  ;;  %v1941_v25 = vshll.u32 %v3449_v10, 16  ;;  %v3471_v57 = vand.u32 65535, %v3451_v34 }
  0xdc   :  { %4597 = vst [vmem:[#allocation39_spill] sm:$0xff] %v3460_v28  ;;  %v1937_v49 = vmul.u32 %v1935_v23, %v1933_v12  ;;  %v3474_v17 = vmul.u32 %v1935_v23, %v1934_v62  ;;  %v3476_v35 = vmul.u32 %v1936_v61, %v1934_v62  ;;  %v3479_v43 = vshrl.u32 %v3451_v34, 16  ;;  %v1407_v61 = vpop.permute.xlu1 %1406  ;;  %v4634_v34 = vld [vmem:[#allocation13_spill] sm:$0xff] }
  0xdd   :  { %4598 = vst [vmem:[#allocation40_spill] sm:$0xff] %v3462_v21  ;;  %v3481_v15 = vmul.u32 %v1957_v53, %v1933_v12  ;;  %v3483_v46 = vmul.u32 %v1957_v53, %v1934_v62  ;;  %v1603_v11 = vshrl.u32 %v4581_v41, %v1591_v30  ;;  %v1434_v54 = vsel %vm1433_vm2, %v1432_v14, 0 }
  0xde   :  { %4599 = vst [vmem:[#allocation41_spill] sm:$0xff] %v3465_v0  ;;  %v3486_v52 = vmul.u32 %v1958_v13, %v1934_v62  ;;  %v1606_v47 = vshrl.u32 %v4582_v38, %v1591_v30  ;;  %v1436_v23 = vand.u32 31, %v1434_v54  ;;  %vm3490_vm3 = vc.u32 %v1937_v49, %v1941_v25 }
  0xdf   :  { %4600 = vst [vmem:[#allocation42_spill] sm:$0xff] %v3474_v17  ;;  %v3494_v48 = vshrl.u32 %v1588_v18, 5  ;;  %v1594_v12 = vshrl.u32 %v4583_v29, %v1591_v30  ;;  %v1602_v53 = vshll.u32 %v4572_v44, %v1590_v55  ;;  %v1597_v7 = vshrl.u32 %v4573_v56, %v1591_v30 }
  0xe0   :  { %4601 = vst [vmem:[#allocation43_spill] sm:$0xff] %v3481_v15  ;;  %v1600_v62 = vshrl.u32 %v4572_v44, %v1591_v30  ;;  %v1605_v13 = vshll.u32 %v4581_v41, %v1590_v55  ;;  %v3501_v14 = vsub.s32 32, %v1436_v23  ;;  %v3506_v27 = vadd.s32 %v1941_v25, %v1937_v49 }
  0xe1   :  { %4602 = vst [vmem:[#allocation44_spill] sm:$0xff] %v3483_v46  ;;  %v1593_v46 = vshll.u32 %v4575_v40, %v1590_v55  ;;  %v1604_v18 = vor.u32 %v1603_v11, %v1602_v53  ;;  %v1596_v9 = vshll.u32 %v4583_v29, %v1590_v55  ;;  %v1599_v28 = vshll.u32 %v4573_v56, %v1590_v55 }
  0xe2   :  { %4605 = vst [vmem:[#allocation45_spill] sm:$0xff] %v3506_v27  ;;  %v1607_v4 = vor.u32 %v1606_v47, %v1605_v13  ;;  %v1946_v31 = vsel %vm3490_vm3, 1, %v4580_v22  ;;  %v4606_v21 = vshll.u32 %v3465_v0, 16  ;;  %v4609_v25 = vand.u32 2147483647, %v3378_v37 }
  0xe3   :  { %v1595_v10 = vor.u32 %v1594_v12, %v1593_v46  ;;  %v1598_v11 = vor.u32 %v1597_v7, %v1596_v9  ;;  %v1601_v53 = vor.u32 %v1600_v62, %v1599_v28  ;;  %vm1611_vm5 = vcmp.lt.s32.totalorder %v3494_v48, 4 }
  0xe4   :  { %vm3516_vm4 = vc.u32 %v3481_v15, %v4606_v21  ;;  %v1429_v49 = vand.u32 8388607, %v4609_v25  ;;  %v1449_v55 = vshrl.u32 %v4581_v41, %v3501_v14  ;;  %v1592_v47 = vshrl.u32 %v4575_v40, %v1591_v30 }
  0xe5   :  { %vm1608_vm6 = vcmp.lt.s32.totalorder %v3494_v48, 1  ;;  %v1617_v21 = vsel %vm1611_vm5, %v1604_v18, 920167782  ;;  %v1452_v46 = vshrl.u32 %v4582_v38, %v3501_v14  ;;  %vm1610_vm7 = vcmp.lt.s32.totalorder %v3494_v48, 3 }
  0xe6   :  { %v1621_v9 = vsel %vm1611_vm5, %v1607_v4, 1326507024  ;;  %v3534_v7 = vshrl.u32 %v1434_v54, 5  ;;  %v1448_v28 = vshll.u32 %v4572_v44, %v1436_v23  ;;  %v1440_v30 = vshrl.u32 %v4583_v29, %v3501_v14 }
  0xe7   :  { %v1443_v12 = vshrl.u32 %v4573_v56, %v3501_v14  ;;  %v1446_v62 = vshrl.u32 %v4572_v44, %v3501_v14  ;;  %v1451_v13 = vshll.u32 %v4581_v41, %v1436_v23  ;;  %v1616_v25 = vsel %vm1608_vm6, %v1595_v10, %v1598_v11 }
  0xe8   :  { %v1618_v4 = vsel %vm1610_vm7, %v1601_v53, %v1617_v21  ;;  %v1450_v54 = vor.u32 %v1449_v55, %v1448_v28  ;;  %v1416_v37 = vmul.f32 %v3199_v5, %v1407_v61  ;;  %v1439_v0 = vshll.u32 %v4575_v40, %v1436_v23 }
  0xe9   :  { %v1442_v15 = vshll.u32 %v4583_v29, %v1436_v23  ;;  %v1445_v27 = vshll.u32 %v4573_v56, %v1436_v23  ;;  %v1453_v17 = vor.u32 %v1452_v46, %v1451_v13  ;;  %vm1609_vm8 = vcmp.lt.s32.totalorder %v3494_v48, 2 }
  0xea   :  { %v1613_v3 = vsel %vm1611_vm5, %v1601_v53, 2102212464  ;;  %v1620_v8 = vsel %vm1608_vm6, %v1598_v11, %v1601_v53  ;;  %v1622_v55 = vsel %vm1610_vm7, %v1604_v18, %v1621_v9  ;;  %v3559_v21 = vor.u32 %v1440_v30, %v1439_v0 }
  0xeb   :  { %v3561_v5 = vor.u32 %v1443_v12, %v1442_v15  ;;  %v1447_v61 = vor.u32 %v1446_v62, %v1445_v27  ;;  %vm1457_vm9 = vcmp.lt.s32.totalorder %v3534_v7, 4  ;;  %v3565_v23 = vadd.s32 %v1946_v31, %v3476_v35 }
  0xec   :  { %v1619_v46 = vsel %vm1609_vm8, %v1616_v25, %v1618_v4  ;;  %v1463_v28 = vsel %vm1457_vm9, %v1450_v54, 920167782  ;;  %v3572_v53 = vadd.f32 %v1416_v37, %v3137_v63  ;;  %v1968_v0 = vsel %vm3516_vm4, 1, %v4580_v22 }
  0xed   :  { %v1612_v27 = vsel %vm1608_vm6, %v1592_v47, %v1595_v10  ;;  %v1614_v31 = vsel %vm1610_vm7, %v1598_v11, %v1613_v3  ;;  %v1467_v35 = vsel %vm1457_vm9, %v1453_v17, 1326507024  ;;  %v1623_v15 = vsel %vm1609_vm8, %v1620_v8, %v1622_v55 }
  0xee   :  { %4610 = vst [vmem:[#allocation46_spill] sm:$0xff] %v3572_v53  ;;  %v1430_v18 = vor.u32 8388608, %v1429_v49  ;;  %vm1454_vm10 = vcmp.lt.s32.totalorder %v3534_v7, 1  ;;  %vm1456_vm11 = vcmp.lt.s32.totalorder %v3534_v7, 3  ;;  %v1650_v63 = vshrl.u32 %v1619_v46, 16 }
  0xef   :  { %v1462_v37 = vsel %vm1454_vm10, %v3559_v21, %v3561_v5  ;;  %v1464_v3 = vsel %vm1456_vm11, %v1447_v61, %v1463_v28  ;;  %v4611_v10 = vshll.u32 %v3131_v59, 16  ;;  %v1649_v20 = vand.u32 65535, %v1619_v46 }
  0xf0   :  { %v1466_v8 = vsel %vm1454_vm10, %v3561_v5, %v1447_v61  ;;  %v1468_v17 = vsel %vm1456_vm11, %v1450_v54, %v1467_v35  ;;  %v1733_v49 = vand.u32 2139095040, %v3572_v53  ;;  %v3604_v11 = vsel %vm1609_vm8, %v1612_v27, %v1614_v31 }
  0xf1   :  { %vm452_vm12 = vc.u32 %v3171_v32, %v4611_v10  ;;  %4612 = vst [vmem:[#allocation47_spill] sm:$0xff] %v3604_v11  ;;  %v1628_v47 = vshrl.u32 %v1623_v15, 16  ;;  %vm1455_vm13 = vcmp.lt.s32.totalorder %v3534_v7, 2  ;;  %v3609_v32 = vadd.s32 %v1968_v0, %v3486_v52  ;;  %v4633_v11 = vld [vmem:[#allocation12_spill] sm:$0xff] }
  0xf2   :  { %v453_v9 = vsel %vm452_vm12, 1, %v4580_v22  ;;  %v1627_v30 = vand.u32 65535, %v1623_v15  ;;  %v3613_v12 = vsel %vm1455_vm13, %v1462_v37, %v1464_v3  ;;  %v3615_v62 = vshll.u32 %v1430_v18, 8 }
  0xf3   :  { %v3618_v13 = vmul.u32 %v1650_v63, %v3471_v57  ;;  %v3622_v48 = vsel %vm1455_vm13, %v1466_v8, %v1468_v17  ;;  %v468_v25 = vshll.u32 %v3161_v19, 16  ;;  %v4613_v52 = vshll.u32 %v3088_v1, 16 }
  0xf4   :  { %v3629_v54 = vmul.u32 %v1649_v20, %v3471_v57  ;;  %v1734_v46 = vshrl.u32 %v1733_v49, 23  ;;  %v455_v28 = vadd.s32 %v453_v9, %v3175_v36  ;;  %v3635_v0 = vmul.u32 %v1628_v47, %v3471_v57 }
  0xf5   :  { %v472_v4 = vadd.s32 %v4613_v52, %v3106_v33  ;;  %v3638_v27 = vmul.u32 %v1649_v20, %v3479_v43  ;;  %v1496_v31 = vshrl.u32 %v3613_v12, 16  ;;  %v1654_v33 = vmul.u32 %v1650_v63, %v3479_v43 }
  0xf6   :  { %4614 = vst [vmem:[#allocation48_spill] sm:$0xff] %v3635_v0  ;;  %v1474_v35 = vshrl.u32 %v3622_v48, 16  ;;  %v445_v15 = vshrl.u32 %v3083_v60, 16  ;;  %v3646_v37 = vmul.u32 %v1627_v30, %v3479_v43  ;;  %v4540_v36 = vshll.u32 %v3618_v13, 16 }
  0xf7   :  { %vm474_vm14 = vc.u32 %v472_v4, %v468_v25  ;;  %v1471_v3 = vand.u32 65535, %v3615_v62  ;;  %v1629_v20 = vmul.u32 %v1627_v30, %v3471_v57  ;;  %v1632_v8 = vmul.u32 %v1628_v47, %v3479_v43 }
  0xf8   :  { %v475_v18 = vsel %vm474_vm14, 1, %v4580_v22  ;;  %v2772_v63 = vadd.s32 4294967169, %v1734_v46  ;;  %v456_v17 = vadd.s32 %v455_v28, %v445_v15  ;;  %v1633_v49 = vshll.u32 %v3635_v0, 16 }
  0xf9   :  { %v477_v10 = vadd.s32 %v475_v18, %v3177_v6  ;;  %v1459_v9 = vsel %vm1457_vm9, %v1447_v61, 2102212464  ;;  %v3659_v52 = vmul.u32 %v1496_v31, %v1471_v3  ;;  %v3663_v6 = vmul.u32 %v1474_v35, %v1471_v3 }
  0xfa   :  { %v4541_v57 = vand.u32 2147483647, %v3572_v53  ;;  %v447_v43 = vshrl.u32 %v3131_v59, 16  ;;  %v4615_v47 = vshrl.u32 %v3088_v1, 16  ;;  %vm1659_vm15 = vc.u32 %v3629_v54, %v4540_v36 }
  0xfb   :  { %v1438_v61 = vshrl.u32 %v4575_v40, %v3501_v14  ;;  %v1495_v28 = vand.u32 65535, %v3613_v12  ;;  %v1473_v15 = vand.u32 65535, %v3622_v48  ;;  %v1740_v18 = vadd.s32 1, %v2772_v63  ;;  %v4624_v48 = vld [vmem:[#allocation18_spill] sm:$0xff] }
  0xfc   :  { %v478_v30 = vadd.s32 %v477_v10, %v4615_v47  ;;  %v457_v55 = vadd.s32 %v456_v17, %v447_v43  ;;  %v469_v59 = vshrl.u32 %v3161_v19, 16  ;;  %vm3678_vm0 = vc.u32 %v1629_v20, %v1633_v49 }
  0xfd   :  { %v1458_v10 = vsel %vm1454_vm10, %v1438_v61, %v3559_v21  ;;  %v1460_v14 = vsel %vm1456_vm11, %v3561_v5, %v1459_v9  ;;  %v4542_v47 = vshll.u32 %v3659_v52, 16  ;;  %v1479_v60 = vshll.u32 %v3663_v6, 16 }
  0xfe   :  { %v1737_v63 = vand.u32 8388607, %v4541_v57  ;;  %v476_v19 = vadd.s32 %v472_v4, %v468_v25  ;;  %v479_v17 = vadd.s32 %v478_v30, %v469_v59  ;;  %v1660_v43 = vsel %vm1659_vm15, 1, %v4580_v22 }
  0xff   :  { %v1472_v36 = vshrl.u32 %v3615_v62, 16  ;;  %v4618_v46 = vshll.u32 %v3204_v45, 16  ;;  %v4619_v21 = vshll.u32 %v3192_v50, 16  ;;  %v1475_v9 = vmul.u32 %v1473_v15, %v1471_v3 }
 0x100   :  { %v3700_v61 = vmul.u32 %v1495_v28, %v1471_v3  ;;  %vm1741_vm2 = vcmp.gt.s32.totalorder %v1740_v18, 0  ;;  %vm482_vm3 = vc.u32 %v457_v55, %v476_v19  ;;  %v1638_v25 = vsel %vm3678_vm0, 1, %v4580_v22 }
 0x101   :  { %vm144_vm1 = vc.u32 %v3253_v58, %v4618_v46  ;;  %v164_v5 = vadd.s32 %v4619_v21, %v3215_v42  ;;  %v3707_v4 = vsel %vm1455_vm13, %v1458_v10, %v1460_v14  ;;  %v483_v30 = vadd.s32 1, %v479_v17 }
 0x102   :  { %v160_v58 = vshll.u32 %v3233_v51, 16  ;;  %vm1483_vm4 = vc.u32 %v1475_v9, %v1479_v60  ;;  %vm1505_vm5 = vc.u32 %v3700_v61, %v4542_v47  ;;  %v1738_v42 = vor.u32 8388608, %v1737_v63 }
 0x103   :  { %v145_v3 = vsel %vm144_vm1, 1, %v4580_v22  ;;  %v3714_v46 = vadd.s32 %v1633_v49, %v1629_v20  ;;  %v1742_v59 = vsel %vm1741_vm2, %v1740_v18, 0  ;;  %v484_v1 = vsel %vm482_vm3, %v483_v30, %v479_v17 }
 0x104   :  { %vm166_vm6 = vc.u32 %v164_v5, %v160_v58  ;;  %v3716_v21 = vadd.s32 %v1638_v25, %v1632_v8  ;;  %v3718_v7 = vadd.s32 %v1660_v43, %v1654_v33  ;;  %v3720_v10 = vmul.u32 %v1473_v15, %v1472_v36  ;;  %v4623_v33 = vld [vmem:[#allocation14_spill] sm:$0xff] }
 0x105   :  { %v1484_v57 = vsel %vm1483_vm4, 1, %v4580_v22  ;;  %v1506_v63 = vsel %vm1505_vm5, 1, %v4580_v22  ;;  %v4621_v20 = vmul.u32 %v3044_v24, %v3099_v16  ;;  %v147_v18 = vadd.s32 %v145_v3, %v3257_v39 }
 0x106   :  { %4620 = vst [vmem:[#allocation49_spill] sm:$0xff] %v3718_v7  ;;  %v1744_v17 = vand.u32 31, %v1742_v59  ;;  %v3730_v8 = vshll.u32 %v1738_v42, 8  ;;  %v137_v43 = vshrl.u32 %v4623_v33, 16  ;;  %v167_v15 = vsel %vm166_vm6, 1, %v4580_v22 }
 0x107   :  { %v485_v49 = vadd.s32 %v484_v1, %v4621_v20  ;;  %v1478_v25 = vmul.u32 %v1474_v35, %v1472_v36  ;;  %v3736_v30 = vmul.u32 %v1495_v28, %v1472_v36  ;;  %v1500_v14 = vmul.u32 %v1496_v31, %v1472_v36 }
 0x108   :  { %4622 = vst [vmem:[#allocation50_spill] sm:$0xff] %v3730_v8  ;;  %v139_v42 = vshrl.u32 %v3204_v45, 16  ;;  %v148_v3 = vadd.s32 %v147_v18, %v137_v43  ;;  %v3743_v1 = vadd.s32 %v1479_v60, %v1475_v9  ;;  %v169_v35 = vadd.s32 %v167_v15, %v4624_v48 }
 0x109   :  { %v486_v39 = vadd.s32 536870912, %v485_v49  ;;  %v3745_v20 = vadd.s32 %v1484_v57, %v1478_v25  ;;  %v3747_v33 = vadd.s32 %v1506_v63, %v1500_v14  ;;  %v1745_v28 = vsub.s32 32, %v1744_v17 }
 0x10a   :  { %v3751_v12 = vand.u32 65535, %v3730_v8  ;;  %v3755_v36 = vadd.s32 %v148_v3, %v139_v42  ;;  %v3758_v24 = vshrl.u32 %v3730_v8, 16  ;;  %v3760_v45 = vadd.s32 %v476_v19, %v457_v55 }
 0x10b   :  { %v3753_v31 = vshrl.u32 %v486_v39, 30  ;;  %v161_v60 = vshrl.u32 %v3233_v51, 16  ;;  %v4626_v57 = vshrl.u32 %v3192_v50, 16  ;;  %v3765_v14 = vshrl.u32 %v1742_v59, 5 }
 0x10c   :  { %4625 = vst [vmem:[#allocation14_spill] sm:$0xff] %v3758_v24  ;;  %v1747_v63 = vshll.u32 %v4575_v40, %v1744_v17  ;;  %v3769_v43 = vadd.s32 %v164_v5, %v160_v58  ;;  %v1750_v15 = vshll.u32 %v4583_v29, %v1744_v17  ;;  %v1753_v25 = vshll.u32 %v4573_v56, %v1744_v17 }
 0x10d   :  { %v170_v9 = vadd.s32 %v169_v35, %v4626_v57  ;;  %v488_v18 = vshll.u32 %v3753_v31, 30  ;;  %v1756_v55 = vshll.u32 %v4572_v44, %v1744_v17  ;;  %v1748_v51 = vshrl.u32 %v4583_v29, %v1745_v28  ;;  %v4628_v35 = vld [vmem:[#allocation33_spill] sm:$0xff] }
 0x10e   :  { %vm174_vm7 = vc.u32 %v3755_v36, %v3769_v43  ;;  %v4627_v50 = vshll.u32 %v3434_v2, 16  ;;  %v1751_v5 = vshrl.u32 %v4573_v56, %v1745_v28  ;;  %v1754_v58 = vshrl.u32 %v4572_v44, %v1745_v28  ;;  %v4629_v56 = vld [vmem:[#allocation29_spill] sm:$0xff] }
 0x10f   :  { %v171_v19 = vadd.s32 %v170_v9, %v161_v60  ;;  %v3775_v39 = vsub.s32 %v485_v49, %v488_v18  ;;  %v1759_v3 = vshll.u32 %v4581_v41, %v1744_v17  ;;  %vm1762_vm9 = vcmp.lt.s32.totalorder %v3765_v14, 1  ;;  %v4631_v18 = vld [vmem:[#allocation40_spill] sm:$0xff] }
 0x110   :  { %vm298_vm8 = vc.u32 %v3458_v26, %v4627_v50  ;;  %v1757_v49 = vshrl.u32 %v4581_v41, %v1745_v28  ;;  %v1760_v48 = vshrl.u32 %v4582_v38, %v1745_v28  ;;  %v4630_v60 = vshll.u32 %v4629_v56, 16  ;;  %v4632_v50 = vld [vmem:[#allocation35_spill] sm:$0xff] }
 0x111   :  { %v175_v59 = vadd.s32 1, %v171_v19  ;;  %v299_v42 = vsel %vm298_vm8, 1, %v4580_v22  ;;  %vm490_vm10 = vcmp.lt.s32.totalorder %v3775_v39, 0  ;;  %v491_v29 = vsub.s32 0, %v3775_v39 }
 0x112   :  { %v318_v44 = vadd.s32 %v4630_v60, %v4628_v35  ;;  %v1749_v57 = vor.u32 %v1748_v51, %v1747_v63  ;;  %v301_v17 = vadd.s32 %v299_v42, %v4631_v18  ;;  %v314_v47 = vshll.u32 %v4632_v50, 16 }
 0x113   :  { %v176_v26 = vsel %vm174_vm7, %v175_v59, %v171_v19  ;;  %v492_v9 = vsel %vm490_vm10, %v491_v29, %v3775_v39  ;;  %v1752_v16 = vor.u32 %v1751_v5, %v1750_v15  ;;  %v1755_v53 = vor.u32 %v1754_v58, %v1753_v25  ;;  %v4636_v19 = vld [vmem:[#allocation30_spill] sm:$0xff]  ;;  %v4638_v58 = vld [vmem:[#allocation8_spill] sm:$0xff] }
 0x114   :  { %v493_v8 = vclz %v492_v9  ;;  %v4635_v41 = vmul.u32 %v4633_v11, %v4634_v34  ;;  %v1746_v38 = vshrl.u32 %v4575_v40, %v1745_v28  ;;  %vm1764_vm11 = vcmp.lt.s32.totalorder %v3765_v14, 3  ;;  %v4637_v28 = vld [vmem:[#allocation39_spill] sm:$0xff] }
 0x115   :  { %v291_v59 = vshrl.u32 %v4636_v19, 16  ;;  %vm320_vm12 = vc.u32 %v318_v44, %v314_v47  ;;  %v1758_v63 = vor.u32 %v1757_v49, %v1756_v55  ;;  %v1761_v51 = vor.u32 %v1760_v48, %v1759_v3  ;;  %v4639_v49 = vld [vmem:[#allocation21_spill] sm:$0xff] }
 0x116   :  { %v177_v24 = vadd.s32 %v176_v26, %v4635_v41  ;;  %vm1765_vm13 = vcmp.lt.s32.totalorder %v3765_v14, 4  ;;  %v2749_v42 = vadd.s32 4294967294, %v493_v8  ;;  %v1766_v15 = vsel %vm1762_vm9, %v1746_v38, %v1749_v57  ;;  %v4641_v26 = vld [vmem:[#allocation26_spill] sm:$0xff] }
 0x117   :  { %v302_v5 = vadd.s32 %v301_v17, %v291_v59  ;;  %v321_v34 = vsel %vm320_vm12, 1, %v4580_v22  ;;  %v1767_v40 = vsel %vm1765_vm13, %v1755_v53, 2102212464  ;;  %v1770_v11 = vsel %vm1762_vm9, %v1749_v57, %v1752_v16 }
 0x118   :  { %v178_v25 = vadd.s32 536870912, %v177_v24  ;;  %vm2750_vm14 = vcmp.lt.s32.totalorder %v2749_v42, 0  ;;  %v323_v55 = vadd.s32 %v321_v34, %v4637_v28  ;;  %vm389_vm15 = vcmp.lt.s32.totalorder %v4638_v58, 0 }
 0x119   :  { %v496_v3 = vsel %vm2750_vm14, 0, %v2749_v42  ;;  %v293_v29 = vshrl.u32 %v3434_v2, 16  ;;  %v4640_v48 = vshll.u32 %v4639_v49, 16  ;;  %vm1763_vm1 = vcmp.lt.s32.totalorder %v3765_v14, 2 }
 0x11a   :  { %v3813_v8 = vshrl.u32 %v178_v25, 30  ;;  %v497_v35 = vsub.s32 32, %v496_v3  ;;  %v501_v60 = vsub.s32 4294967266, %v496_v3  ;;  %v315_v57 = vshrl.u32 %v4632_v50, 16 }
 0x11b   :  { %vm606_vm0 = vc.u32 %v4641_v26, %v4640_v48  ;;  %v4642_v9 = vshrl.u32 %v4629_v56, 16  ;;  %v1774_v17 = vsel %vm1762_vm9, %v1752_v16, %v1755_v53  ;;  %v498_v41 = vshll.u32 %v3775_v39, %v496_v3  ;;  %v4646_v26 = vld [vmem:[#allocation27_spill] sm:$0xff] }
 0x11c   :  { %v180_v2 = vshll.u32 %v3813_v8, 30  ;;  %v3827_v38 = vadd.s32 %v302_v5, %v293_v29  ;;  %v4643_v19 = vand.u32 2147483647, %v4638_v58  ;;  %v499_v50 = vshrl.u32 %v3760_v45, %v497_v35  ;;  %v4648_v35 = vld [vmem:[#allocation22_spill] sm:$0xff] }
 0x11d   :  { %v324_v18 = vadd.s32 %v323_v55, %v4642_v9  ;;  %v502_v42 = vadd.s32 127, %v501_v60  ;;  %v607_v25 = vsel %vm606_vm0, 1, %v4580_v22  ;;  %v1768_v34 = vsel %vm1764_vm11, %v1752_v16, %v1767_v40  ;;  %v4647_v40 = vld [vmem:[#allocation24_spill] sm:$0xff] }
 0x11e   :  { %vm3831_vm2 = vcmp.le.f32.partialorder %v4643_v19, 0.7853982  ;;  %v1771_v39 = vsel %vm1765_vm13, %v1758_v63, 920167782  ;;  %v1775_v5 = vsel %vm1765_vm13, %v1761_v51, 1326507024  ;;  %v3843_v28 = vsub.s32 %v177_v24, %v180_v2 }
 0x11f   :  { %v325_v56 = vadd.s32 %v324_v18, %v315_v57  ;;  %v500_v55 = vor.u32 %v499_v50, %v498_v41  ;;  %v503_v3 = vshll.u32 %v502_v42, 23  ;;  %v511_v29 = vsub.s32 4, %v3753_v31  ;;  %v4650_v18 = vld [vmem:[#allocation20_spill] sm:$0xff]  ;;  %v4651_v2 = vld [vmem:[#allocation25_spill] sm:$0xff] }
 0x120   :  { %v3846_v45 = vadd.s32 %v318_v44, %v314_v47  ;;  %vm182_vm3 = vcmp.lt.s32.totalorder %v3843_v28, 0  ;;  %v183_v48 = vsub.s32 0, %v3843_v28  ;;  %v609_v16 = vadd.s32 %v607_v25, %v4646_v26 }
 0x121   :  { %v4649_v60 = vshll.u32 %v4648_v35, 16  ;;  %v1772_v24 = vsel %vm1764_vm11, %v1755_v53, %v1771_v39  ;;  %v504_v51 = vor.u32 4788187, %v503_v3  ;;  %v329_v9 = vadd.s32 1, %v325_v56 }
 0x122   :  { %vm328_vm4 = vc.u32 %v3827_v38, %v3846_v45  ;;  %v1776_v47 = vsel %vm1764_vm11, %v1758_v63, %v1775_v5  ;;  %v184_v44 = vsel %vm182_vm3, %v183_v48, %v3843_v28  ;;  %v599_v41 = vshrl.u32 %v4650_v18, 16  ;;  %v3892_v18 = vpop.permute.xlu0 %1331 }
 0x123   :  { %v626_v57 = vadd.s32 %v4649_v60, %v4647_v40  ;;  %v622_v19 = vshll.u32 %v4651_v2, 16  ;;  %v505_v50 = vand.u32 2147483647, %v504_v51  ;;  %v507_v42 = vcvt.s32.f32 %v500_v55  ;;  %v4653_v40 = vld [vmem:[#allocation9_spill] sm:$0xff] }
 0x124   :  { %v512_v53 = vsel %vm389_vm15, %v511_v29, %v3753_v31  ;;  %v185_v25 = vclz %v184_v44  ;;  %v3868_v39 = vsel %vm1763_vm1, %v1766_v15, %v1768_v34  ;;  %v330_v3 = vsel %vm328_vm4, %v329_v9, %v325_v56  ;;  %v4654_v56 = vld [vmem:[#allocation19_spill] sm:$0xff]  ;;  %v4655_v34 = vld [vmem:[#allocation32_spill] sm:$0xff] }
 0x125   :  { %4652 = vst [vmem:[#allocation18_spill] sm:$0xff] %v3868_v39  ;;  %v610_v26 = vadd.s32 %v609_v16, %v599_v41  ;;  %vm628_vm5 = vc.u32 %v626_v57, %v622_v19  ;;  %v3872_v63 = vsel %vm1763_vm1, %v1770_v11, %v1772_v24  ;;  %v3876_v5 = vsel %vm1763_vm1, %v1774_v17, %v1776_v47  ;;  %v4657_v47 = vld [vmem:[#allocation31_spill] sm:$0xff]  ;;  %v1336_v39 = vpop.permute.xlu2 %1335 }
 0x126   :  { %v508_v55 = vmul.f32 %v507_v42, %v505_v50  ;;  %v2743_v48 = vadd.s32 4294967294, %v185_v25  ;;  %vm81_vm6 = vcmp.lt.s32.totalorder %v4653_v40, 0  ;;  %v514_v31 = vsel %vm3831_vm2, 0, %v512_v53 }
 0x127   :  { %v173_v15 = vadd.s32 %v3769_v43, %v3755_v36  ;;  %v4656_v29 = vmul.u32 %v4654_v56, %v4655_v34  ;;  %v601_v11 = vshrl.u32 %v4639_v49, 16  ;;  %v203_v14 = vsub.s32 4, %v3813_v8 }
 0x128   :  { %v509_v60 = vxor.u32 2147483648, %v508_v55  ;;  %vm2744_vm7 = vcmp.lt.s32.totalorder %v2743_v48, 0  ;;  %v629_v17 = vsel %vm628_vm5, 1, %v4580_v22  ;;  %v4658_v43 = vand.u32 2147483647, %v4653_v40 }
 0x129   :  { %v331_v16 = vadd.s32 %v330_v3, %v4656_v29  ;;  %v188_v24 = vsel %vm2744_vm7, 0, %v2743_v48  ;;  %v3889_v9 = vadd.s32 %v610_v26, %v601_v11  ;;  %v631_v44 = vadd.s32 %v629_v17, %v4657_v47 }
 0x12a   :  { %v510_v36 = vsel %vm389_vm15, %v509_v60, %v508_v55  ;;  %vm3898_vm8 = vcmp.le.f32.partialorder %v4658_v43, 0.7853982  ;;  %v189_v41 = vsub.s32 32, %v188_v24  ;;  %v193_v50 = vsub.s32 4294967266, %v188_v24 }
 0x12b   :  { %v332_v51 = vadd.s32 536870912, %v331_v16  ;;  %v623_v42 = vshrl.u32 %v4651_v2, 16  ;;  %v3906_v53 = vsel %vm3831_vm2, %v4638_v58, %v510_v36  ;;  %v3910_v3 = vadd.s32 %v626_v57, %v622_v19 }
 0x12c   :  { %v4661_v26 = vshrl.u32 %v4648_v35, 16  ;;  %v515_v48 = vmul.f32 %v3906_v53, %v3906_v53  ;;  %v190_v56 = vshll.u32 %v3843_v28, %v188_v24  ;;  %v191_v34 = vshrl.u32 %v173_v15, %v189_v41 }
 0x12d   :  { %v3908_v25 = vshrl.u32 %v332_v51, 30  ;;  %v194_v29 = vadd.s32 127, %v193_v50  ;;  %v1149_v2 = vadd.s32 3, %v514_v31  ;;  %vm636_vm9 = vc.u32 %v3889_v9, %v3910_v3 }
 0x12e   :  { %v632_v55 = vadd.s32 %v631_v44, %v4661_v26  ;;  %v516_v60 = vmul.f32 -0.001358992, %v515_v48  ;;  %v523_v57 = vmul.f32 -0.00019511016, %v515_v48  ;;  %v192_v19 = vor.u32 %v191_v34, %v190_v56  ;;  %v4663_v34 = vld [vmem:[#allocation16_spill] sm:$0xff] }
 0x12f   :  { %v334_v11 = vshll.u32 %v3908_v25, 30  ;;  %v195_v17 = vshll.u32 %v194_v29, 23  ;;  %v3920_v35 = vand.u32 3, %v514_v31  ;;  %v1315_v51 = vlaneseq  ;;  %v4664_v29 = vld [vmem:[#allocation17_spill] sm:$0xff] }
 0x130   :  { %v633_v59 = vadd.s32 %v632_v55, %v623_v42  ;;  %v517_v28 = vadd.f32 0.041655596, %v516_v60  ;;  %v524_v15 = vadd.f32 0.008332121, %v523_v57  ;;  %v204_v36 = vsel %vm81_vm6, %v203_v14, %v3813_v8  ;;  %v3941_v60 = vpop.permute.xlu0 %1337 }
 0x131   :  { %v3922_v47 = vsub.s32 %v331_v16, %v334_v11  ;;  %v196_v24 = vor.u32 4788187, %v195_v17  ;;  %v3927_v43 = vand.u32 3, %v1149_v2  ;;  %v4662_v16 = vld [vmem:[#allocation11_spill] sm:$0xff]  ;;  %v199_v55 = vcvt.s32.f32 %v192_v19 }
 0x132   :  { %v637_v44 = vadd.s32 1, %v633_v59  ;;  %vm235_vm11 = vcmp.lt.s32.totalorder %v4662_v16, 0  ;;  %v518_v50 = vmul.f32 %v517_v28, %v515_v48  ;;  %v525_v42 = vmul.f32 %v524_v15, %v515_v48 }
 0x133   :  { %vm336_vm10 = vcmp.lt.s32.totalorder %v3922_v47, 0  ;;  %v337_v41 = vsub.s32 0, %v3922_v47  ;;  %v197_v26 = vand.u32 2147483647, %v196_v24  ;;  %v1316_v56 = vand.u32 127, %v1315_v51 }
 0x134   :  { %v638_v31 = vsel %vm636_vm9, %v637_v44, %v633_v59  ;;  %v206_v8 = vsel %vm3898_vm8, 0, %v204_v36  ;;  %v4665_v2 = vmul.u32 %v4663_v34, %v4664_v29  ;;  %v519_v57 = vadd.f32 -0.4999988, %v518_v50 }
 0x135   :  { %v338_v14 = vsel %vm336_vm10, %v337_v41, %v3922_v47  ;;  %v526_v59 = vadd.f32 -0.16666654, %v525_v42  ;;  %v200_v17 = vmul.f32 %v199_v55, %v197_v26  ;;  %vm533_vm12 = vcmp.eq.s32.totalorder %v3920_v35, 0 }
 0x136   :  { %v639_v11 = vadd.s32 %v638_v31, %v4665_v2  ;;  %v339_v44 = vclz %v338_v14  ;;  %vm536_vm13 = vcmp.eq.s32.totalorder %v3920_v35, 2  ;;  %vm1152_vm14 = vcmp.eq.s32.totalorder %v3927_v43, 0 }
 0x137   :  { %vm1155_vm15 = vcmp.eq.s32.totalorder %v3927_v43, 2  ;;  %v327_v19 = vadd.s32 %v3846_v45, %v3827_v38  ;;  %v520_v51 = vmul.f32 %v519_v57, %v515_v48  ;;  %v527_v28 = vmul.f32 %v526_v59, %v515_v48 }
 0x138   :  { %vm532_vm0 = vcmp.lt.s32.totalorder %v3920_v35, 2  ;;  %vm1151_vm1 = vcmp.lt.s32.totalorder %v3927_v43, 2  ;;  %v201_v15 = vxor.u32 2147483648, %v200_v17  ;;  %v2746_v24 = vadd.s32 4294967294, %v339_v44 }
 0x139   :  { %vm530_vm2 = vweird.f32 %v4638_v58  ;;  %v1317_v36 = vand.u32 1, %v1316_v56  ;;  %v3952_v41 = vand.u32 3, %v206_v8  ;;  %v357_v31 = vsub.s32 4, %v3908_v25 }
 0x13a   :  { %v640_v50 = vadd.s32 536870912, %v639_v11  ;;  %v521_v42 = vadd.f32 1.0, %v520_v51  ;;  %v528_v26 = vadd.f32 1.0, %v527_v28  ;;  %v202_v38 = vsel %vm81_vm6, %v201_v15, %v200_v17 }
 0x13b   :  { %vm2747_vm3 = vcmp.lt.s32.totalorder %v2746_v24, 0  ;;  %v3960_v45 = vsel %vm3898_vm8, %v4653_v40, %v202_v38  ;;  %v839_v48 = vadd.s32 3, %v206_v8  ;;  %v4666_v2 = vand.u32 2147483647, %v4662_v16 }
 0x13c   :  { %v342_v55 = vsel %vm2747_vm3, 0, %v2746_v24  ;;  %v3962_v14 = vshrl.u32 %v640_v50, 30  ;;  %v529_v56 = vmul.f32 %v528_v26, %v3906_v53  ;;  %v537_v34 = vxor.u32 2147483648, %v521_v42  ;;  %v3984_v24 = vpop.permute.xlu1 %1333 }
 0x13d   :  { %v207_v29 = vmul.f32 %v3960_v45, %v3960_v45  ;;  %vm3969_vm4 = vcmp.le.f32.partialorder %v4666_v2, 0.7853982  ;;  %v343_v59 = vsub.s32 32, %v342_v55  ;;  %vm3973_vm5 = vcmp.eq.s32.totalorder %v1317_v36, 0  ;;  %v1344_v2 = vpop.permute.xlu0 %1343 }
 0x13e   :  { %v347_v8 = vsub.s32 4294967266, %v342_v55  ;;  %v358_v53 = vsel %vm235_vm11, %v357_v31, %v3908_v25  ;;  %v642_v17 = vshll.u32 %v3962_v14, 30  ;;  %v534_v44 = vxor.u32 2147483648, %v529_v56 }
 0x13f   :  { %v538_v51 = vsel %vm536_vm13, %v537_v34, %v529_v56  ;;  %v208_v28 = vmul.f32 -0.001358992, %v207_v29  ;;  %v344_v15 = vshll.u32 %v3922_v47, %v342_v55  ;;  %v1157_v36 = vsel %vm1155_vm15, %v537_v34, %v529_v56 }
 0x140   :  { %v215_v50 = vmul.f32 -0.00019511016, %v207_v29  ;;  %v345_v26 = vshrl.u32 %v327_v19, %v343_v59  ;;  %v348_v38 = vadd.s32 127, %v347_v8  ;;  %v535_v25 = vsel %vm533_vm12, %v521_v42, %v534_v44 }
 0x141   :  { %v1154_v31 = vsel %vm1152_vm14, %v521_v42, %v534_v44  ;;  %v209_v7 = vadd.f32 0.041655596, %v208_v28  ;;  %v3992_v0 = vsub.s32 %v639_v11, %v642_v17  ;;  %v539_v47 = vsel %vm532_vm0, %v535_v25, %v538_v51 }
 0x142   :  { %v1158_v55 = vsel %vm1151_vm1, %v1154_v31, %v1157_v36  ;;  %v216_v56 = vadd.f32 0.008332121, %v215_v50  ;;  %v346_v19 = vor.u32 %v345_v26, %v344_v15  ;;  %v540_v34 = vsel %vm530_vm2, nan, %v539_v47 }
 0x143   :  { %v1159_v59 = vsel %vm530_vm2, nan, %v1158_v55  ;;  %v210_v8 = vmul.f32 %v209_v7, %v207_v29  ;;  %v349_v42 = vshll.u32 %v348_v38, 23  ;;  %v1349_v11 = vsel %vm3973_vm5, %v1336_v39, %v1344_v2  ;;  %v2814_v7 = vld [vmem:[%s4471_s3 + $0x10] sm:$0xff] }
 0x144   :  { %v1321_v44 = vsub.f32 0.0, %v1159_v59  ;;  %v217_v17 = vmul.f32 %v216_v56, %v207_v29  ;;  %v840_v35 = vand.u32 3, %v839_v48  ;;  %vm644_vm6 = vcmp.lt.s32.totalorder %v3992_v0, 0 }
 0x145   :  { %v211_v51 = vadd.f32 -0.4999988, %v210_v8  ;;  %v350_v28 = vor.u32 4788187, %v349_v42  ;;  %v645_v43 = vsub.s32 0, %v3992_v0  ;;  %v1353_v58 = vmul.f32 %v2814_v7, %v540_v34 }
 0x146   :  { %v1325_v15 = vsel %vm3973_vm5, %v1321_v44, %v1159_v59  ;;  %v218_v36 = vadd.f32 -0.16666654, %v217_v17  ;;  %vm228_vm7 = vcmp.eq.s32.totalorder %v3952_v41, 2  ;;  %v360_v39 = vsel %vm3969_vm4, 0, %v358_v53 }
 0x147   :  { %v1357_v48 = vmul.f32 %v1349_v11, %v1325_v15  ;;  %v212_v50 = vmul.f32 %v211_v51, %v207_v29  ;;  %vm225_vm8 = vcmp.eq.s32.totalorder %v3952_v41, 0  ;;  %v351_v26 = vand.u32 2147483647, %v350_v28 }
 0x148   :  { %v353_v38 = vcvt.s32.f32 %v346_v19  ;;  %v219_v2 = vmul.f32 %v218_v36, %v207_v29  ;;  %vm224_vm9 = vcmp.lt.s32.totalorder %v3952_v41, 2  ;;  %vm841_vm10 = vcmp.lt.s32.totalorder %v840_v35, 2  ;;  %v1340_v19 = vpop.permute.xlu1 %1339 }
 0x149   :  { %v646_v25 = vsel %vm644_vm6, %v645_v43, %v3992_v0  ;;  %v4671_v31 = vshll.u32 %v3720_v10, 16  ;;  %v1361_v53 = vadd.f32 %v1357_v48, %v1353_v58  ;;  %v213_v55 = vadd.f32 1.0, %v212_v50 }
 0x14a   :  { %vm222_vm13 = vweird.f32 %v4653_v40  ;;  %v354_v56 = vmul.f32 %v353_v38, %v351_v26  ;;  %v647_v29 = vclz %v646_v25  ;;  %v220_v34 = vadd.f32 1.0, %v219_v2 }
 0x14b   :  { %vm4022_vm12 = vc.u32 %v3743_v1, %v4671_v31  ;;  %vm842_vm14 = vcmp.eq.s32.totalorder %v840_v35, 0  ;;  %vm845_vm15 = vcmp.eq.s32.totalorder %v840_v35, 2  ;;  %v994_v59 = vadd.s32 3, %v360_v39  ;;  %1365 = vst [vmem:[#allocation2 + $0x10] sm:$0xff] %v1361_v53 }
 0x14c   :  { %v229_v8 = vxor.u32 2147483648, %v213_v55  ;;  %v355_v42 = vxor.u32 2147483648, %v354_v56  ;;  %v635_v1 = vadd.s32 %v3910_v3, %v3889_v9  ;;  %v2752_v44 = vadd.s32 4294967294, %v647_v29 }
 0x14d   :  { %v221_v11 = vmul.f32 %v220_v34, %v3960_v45  ;;  %v1480_v17 = vshrl.u32 %v3663_v6, 16  ;;  %v1482_v51 = vshrl.u32 %v3720_v10, 16  ;;  %v1488_v28 = vsel %vm4022_vm12, 1, %v4580_v22 }
 0x14e   :  { %v1347_v43 = vsel %vm3973_vm5, %v3892_v18, %v1340_v19  ;;  %v356_v15 = vsel %vm235_vm11, %v355_v42, %v354_v56  ;;  %v4040_v7 = vand.u32 3, %v360_v39  ;;  %vm2753_vm0 = vcmp.lt.s32.totalorder %v2752_v44, 0  ;;  %v4674_v39 = vld [vmem:[#allocation10_spill] sm:$0xff] }
 0x14f   :  { %v226_v9 = vxor.u32 2147483648, %v221_v11  ;;  %v4045_v6 = vsel %vm3969_vm4, %v4662_v16, %v356_v15  ;;  %v4047_v10 = vand.u32 3, %v994_v59  ;;  %v665_v3 = vsub.s32 4, %v3962_v14 }
 0x150   :  { %v230_v45 = vsel %vm228_vm7, %v229_v8, %v221_v11  ;;  %v361_v18 = vmul.f32 %v4045_v6, %v4045_v6  ;;  %v650_v58 = vsel %vm2753_vm0, 0, %v2752_v44  ;;  %v1490_v36 = vadd.s32 %v1488_v28, %v3745_v20 }
 0x151   :  { %vm543_vm11 = vcmp.lt.s32.totalorder %v4674_v39, 0  ;;  %v227_v57 = vsel %vm225_vm8, %v213_v55, %v226_v9  ;;  %v844_v48 = vsel %vm842_vm14, %v213_v55, %v226_v9  ;;  %v847_v50 = vsel %vm845_vm15, %v229_v8, %v221_v11  ;;  %v2815_v11 = vld [vmem:[%s4471_s3] sm:$0xff] }
 0x152   :  { %v651_v26 = vsub.s32 32, %v650_v58  ;;  %v231_v38 = vsel %vm224_vm9, %v227_v57, %v230_v45  ;;  %v848_v2 = vsel %vm841_vm10, %v844_v48, %v847_v50  ;;  %v362_v25 = vmul.f32 -0.001358992, %v361_v18 }
 0x153   :  { %v369_v31 = vmul.f32 -0.00019511016, %v361_v18  ;;  %v232_v20 = vsel %vm222_vm13, nan, %v231_v38  ;;  %v849_v47 = vsel %vm222_vm13, nan, %v848_v2  ;;  %v655_v56 = vsub.s32 4294967266, %v650_v58 }
 0x154   :  { %v653_v53 = vshrl.u32 %v635_v1, %v651_v26  ;;  %v1319_v29 = vsub.f32 0.0, %v849_v47  ;;  %v363_v55 = vadd.f32 0.041655596, %v362_v25  ;;  %v4675_v34 = vand.u32 2147483647, %v4674_v39 }
 0x155   :  { %v370_v19 = vadd.f32 0.008332121, %v369_v31  ;;  %v1503_v35 = vshll.u32 %v3736_v30, 16  ;;  %v652_v59 = vshll.u32 %v3992_v0, %v650_v58  ;;  %v656_v8 = vadd.s32 127, %v655_v56 }
 0x156   :  { %vm4069_vm1 = vcmp.le.f32.partialorder %v4675_v34, 0.7853982  ;;  %v1491_v42 = vadd.s32 %v1490_v36, %v1480_v17  ;;  %v4678_v40 = vshll.u32 %v3659_v52, 16  ;;  %v1323_v44 = vsel %vm3973_vm5, %v1319_v29, %v849_v47  ;;  %v4680_v29 = vld [vmem:[#allocation42_spill] sm:$0xff] }
 0x157   :  { %v1351_v28 = vmul.f32 %v2815_v11, %v232_v20  ;;  %v364_v15 = vmul.f32 %v363_v55, %v361_v18  ;;  %v371_v9 = vmul.f32 %v370_v19, %v361_v18  ;;  %v1355_v45 = vmul.f32 %v1347_v43, %v1323_v44  ;;  %v4682_v19 = vld [vmem:[#allocation45_spill] sm:$0xff]  ;;  %v4684_v44 = vld [vmem:[#allocation43_spill] sm:$0xff] }
 0x158   :  { %v1507_v1 = vadd.s32 %v4678_v40, %v3700_v61  ;;  %v654_v57 = vor.u32 %v653_v53, %v652_v59  ;;  %v657_v48 = vshll.u32 %v656_v8, 23  ;;  %vm382_vm3 = vcmp.eq.s32.totalorder %v4040_v7, 2  ;;  %v1342_v8 = vpop.permute.xlu2 %1341  ;;  %v4685_v11 = vld [vmem:[#allocation41_spill] sm:$0xff] }
 0x159   :  { %v365_v0 = vadd.f32 -0.4999988, %v364_v15  ;;  %v372_v17 = vadd.f32 -0.16666654, %v371_v9  ;;  %v1359_v58 = vadd.f32 %v1355_v45, %v1351_v28  ;;  %vm379_vm4 = vcmp.eq.s32.totalorder %v4040_v7, 0 }
 0x15a   :  { %vm1509_vm2 = vc.u32 %v1507_v1, %v1503_v35  ;;  %vm997_vm6 = vcmp.eq.s32.totalorder %v4047_v10, 0  ;;  %vm1000_vm7 = vcmp.eq.s32.totalorder %v4047_v10, 2  ;;  %v658_v36 = vor.u32 4788187, %v657_v48 }
 0x15b   :  { %v1510_v61 = vsel %vm1509_vm2, 1, %v4580_v22  ;;  %v366_v43 = vmul.f32 %v365_v0, %v361_v18  ;;  %v373_v26 = vmul.f32 %v372_v17, %v361_v18  ;;  %vm378_vm8 = vcmp.lt.s32.totalorder %v4040_v7, 2  ;;  %1363 = vst [vmem:[#allocation2] sm:$0xff] %v1359_v58 }
 0x15c   :  { %v1512_v50 = vadd.s32 %v1510_v61, %v3747_v33  ;;  %vm996_vm9 = vcmp.lt.s32.totalorder %v4047_v10, 2  ;;  %v666_v38 = vsel %vm543_vm11, %v665_v3, %v3962_v14  ;;  %v4094_v2 = vadd.s32 %v1491_v42, %v1482_v51 }
 0x15d   :  { %vm376_vm10 = vweird.f32 %v4662_v16  ;;  %v659_v25 = vand.u32 2147483647, %v658_v36  ;;  %v661_v31 = vcvt.s32.f32 %v654_v57  ;;  %v1504_v20 = vshrl.u32 %v3736_v30, 16  ;;  %v4687_v57 = vld [vmem:[#allocation36_spill] sm:$0xff]  ;;  %v2816_v16 = vld [vmem:[%s4471_s3 + $0x8] sm:$0xff] }
 0x15e   :  { %v4679_v33 = vshrl.u32 %v3659_v52, 16  ;;  %v367_v47 = vadd.f32 1.0, %v366_v43  ;;  %v374_v53 = vadd.f32 1.0, %v373_v26  ;;  %v4100_v56 = vadd.s32 %v1507_v1, %v1503_v35  ;;  %v4683_v52 = vld [vmem:[#allocation44_spill] sm:$0xff] }
 0x15f   :  { %v4681_v55 = vshll.u32 %v4680_v29, 16  ;;  %v662_v14 = vmul.f32 %v661_v31, %v659_v25  ;;  %v668_v51 = vsel %vm4069_vm1, 0, %v666_v38  ;;  %v1965_v35 = vshll.u32 %v4683_v52, 16 }
 0x160   :  { %v1513_v18 = vadd.s32 %v1512_v50, %v4679_v33  ;;  %v375_v30 = vmul.f32 %v374_v53, %v4045_v6  ;;  %v383_v59 = vxor.u32 2147483648, %v367_v47  ;;  %vm1517_vm13 = vc.u32 %v4094_v2, %v4100_v56 }
 0x161   :  { %vm1949_vm12 = vc.u32 %v4682_v19, %v4681_v55  ;;  %v663_v42 = vxor.u32 2147483648, %v662_v14  ;;  %v4686_v28 = vshll.u32 %v4685_v11, 16  ;;  %v1348_v6 = vsel %vm3973_vm5, %v3984_v24, %v1342_v8 }
 0x162   :  { %v1514_v3 = vadd.s32 %v1513_v18, %v1504_v20  ;;  %v1950_v34 = vsel %vm1949_vm12, 1, %v4580_v22  ;;  %v380_v9 = vxor.u32 2147483648, %v375_v30  ;;  %v384_v45 = vsel %vm382_vm3, %v383_v59, %v375_v30 }
 0x163   :  { %v1952_v1 = vadd.s32 %v1950_v34, %v3565_v23  ;;  %v1969_v15 = vadd.s32 %v4686_v28, %v4684_v44  ;;  %v1942_v48 = vshrl.u32 %v4687_v57, 16  ;;  %v1002_v0 = vsel %vm1000_vm7, %v383_v59, %v375_v30 }
 0x164   :  { %v1518_v40 = vadd.s32 1, %v1514_v3  ;;  %v664_v23 = vsel %vm543_vm11, %v663_v42, %v662_v14  ;;  %v381_v61 = vsel %vm379_vm4, %v367_v47, %v380_v9  ;;  %v999_v58 = vsel %vm997_vm6, %v367_v47, %v380_v9 }
 0x165   :  { %vm1971_vm14 = vc.u32 %v1969_v15, %v1965_v35  ;;  %v667_v24 = vsel %vm4069_vm1, %v4674_v39, %v664_v23  ;;  %v4688_v36 = vmul.u32 %v3615_v62, %v3707_v4  ;;  %v385_v43 = vsel %vm378_vm8, %v381_v61, %v384_v45 }
 0x166   :  { %v1519_v17 = vsel %vm1517_vm13, %v1518_v40, %v1514_v3  ;;  %v1003_v26 = vsel %vm996_vm9, %v999_v58, %v1002_v0  ;;  %v669_v38 = vmul.f32 %v667_v24, %v667_v24  ;;  %v1953_v25 = vadd.s32 %v1952_v1, %v1942_v48 }
 0x167   :  { %v1520_v50 = vadd.s32 %v1519_v17, %v4688_v36  ;;  %v1004_v31 = vsel %vm376_vm10, nan, %v1003_v26  ;;  %v1944_v33 = vshrl.u32 %v4680_v29, 16  ;;  %v1972_v41 = vsel %vm1971_vm14, 1, %v4580_v22 }
 0x168   :  { %v386_v62 = vsel %vm376_vm10, nan, %v385_v43  ;;  %v1320_v4 = vsub.f32 0.0, %v1004_v31  ;;  %v670_v18 = vmul.f32 -0.001358992, %v669_v38  ;;  %v677_v7 = vmul.f32 -0.00019511016, %v669_v38 }
 0x169   :  { %v1521_v20 = vadd.s32 536870912, %v1520_v50  ;;  %v1304_v47 = vadd.s32 3, %v668_v51  ;;  %v1966_v10 = vshrl.u32 %v4683_v52, 16  ;;  %v1974_v55 = vadd.s32 %v1972_v41, %v3609_v32  ;;  %v4691_v41 = vld [vmem:[#allocation34_spill] sm:$0xff] }
 0x16a   :  { %v1324_v19 = vsel %vm3973_vm5, %v1320_v4, %v1004_v31  ;;  %v671_v14 = vadd.f32 0.041655596, %v670_v18  ;;  %v678_v29 = vadd.f32 0.008332121, %v677_v7  ;;  %v4152_v3 = vadd.s32 %v1953_v25, %v1944_v33 }
 0x16b   :  { %v4146_v53 = vshrl.u32 %v1521_v20, 30  ;;  %v1352_v34 = vmul.f32 %v2816_v16, %v386_v62  ;;  %v1356_v30 = vmul.f32 %v1348_v6, %v1324_v19  ;;  %v4689_v8 = vshrl.u32 %v4685_v11, 16  ;;  %v4692_v62 = vld [vmem:[#allocation38_spill] sm:$0xff] }
 0x16c   :  { %v1781_v32 = vand.u32 65535, %v3876_v5  ;;  %v1782_v42 = vshrl.u32 %v3876_v5, 16  ;;  %v672_v40 = vmul.f32 %v671_v14, %v669_v38  ;;  %v679_v1 = vmul.f32 %v678_v29, %v669_v38 }
 0x16d   :  { %v1523_v59 = vshll.u32 %v4146_v53, 30  ;;  %v1975_v52 = vadd.s32 %v1974_v55, %v4689_v8  ;;  %v1360_v44 = vadd.f32 %v1356_v30, %v1352_v34  ;;  %v4164_v9 = vadd.s32 %v1969_v15, %v1965_v35 }
 0x16e   :  { %v1803_v57 = vand.u32 65535, %v3872_v63  ;;  %v673_v6 = vadd.f32 -0.4999988, %v672_v40  ;;  %v680_v48 = vadd.f32 -0.16666654, %v679_v1  ;;  %v685_v0 = vand.u32 3, %v668_v51 }
 0x16f   :  { %v4162_v28 = vsub.s32 %v1520_v50, %v1523_v59  ;;  %v1976_v45 = vadd.s32 %v1975_v52, %v1966_v10  ;;  %1364 = vst [vmem:[#allocation2 + $0x8] sm:$0xff] %v1360_v44  ;;  %v1305_v11 = vand.u32 3, %v1304_v47  ;;  %vm1979_vm0 = vc.u32 %v4152_v3, %v4164_v9  ;;  %v4695_v40 = vld [vmem:[#allocation28_spill] sm:$0xff] }
 0x170   :  { %v674_v17 = vmul.f32 %v673_v6, %v669_v38  ;;  %v681_v61 = vmul.f32 %v680_v48, %v669_v38  ;;  %v4690_v35 = vshll.u32 %v3646_v37, 16  ;;  %v4177_v51 = vmul.u32 %v1781_v32, %v3751_v12 }
 0x171   :  { %vm1525_vm15 = vcmp.lt.s32.totalorder %v4162_v28, 0  ;;  %v1526_v23 = vsub.s32 0, %v4162_v28  ;;  %v1980_v58 = vadd.s32 1, %v1976_v45  ;;  %v1804_v15 = vshrl.u32 %v3872_v63, 16 }
 0x172   :  { %vm1641_vm11 = vc.u32 %v3714_v46, %v4690_v35  ;;  %vm684_vm1 = vweird.f32 %v4674_v39  ;;  %v675_v50 = vadd.f32 1.0, %v674_v17  ;;  %v682_v43 = vadd.f32 1.0, %v681_v61  ;;  %v4696_v17 = vld [vmem:[#allocation48_spill] sm:$0xff] }
 0x173   :  { %v1527_v36 = vsel %vm1525_vm15, %v1526_v23, %v4162_v28  ;;  %vm686_vm2 = vcmp.lt.s32.totalorder %v685_v0, 2  ;;  %vm687_vm3 = vcmp.eq.s32.totalorder %v685_v0, 0  ;;  %vm690_vm4 = vcmp.eq.s32.totalorder %v685_v0, 2 }
 0x174   :  { %v1528_v26 = vclz %v1527_v36  ;;  %v1981_v38 = vsel %vm1979_vm0, %v1980_v58, %v1976_v45  ;;  %v1642_v46 = vsel %vm1641_vm11, 1, %v4580_v22  ;;  %v683_v25 = vmul.f32 %v682_v43, %v667_v24  ;;  %v2817_v43 = vld [vmem:[%s4471_s3 + $0x18] sm:$0xff]  ;;  %s2885_s3 = smov 128  }
 0x175   :  { %v691_v31 = vxor.u32 2147483648, %v675_v50  ;;  %vm1306_vm6 = vcmp.lt.s32.totalorder %v1305_v11, 2  ;;  %vm1307_vm7 = vcmp.eq.s32.totalorder %v1305_v11, 0  ;;  %vm1310_vm8 = vcmp.eq.s32.totalorder %v1305_v11, 2 }
 0x176   :  { %v2767_v20 = vadd.s32 4294967294, %v1528_v26  ;;  %v1516_v33 = vadd.s32 %v4100_v56, %v4094_v2  ;;  %v4693_v4 = vmul.u32 %v4691_v41, %v4692_v62  ;;  %v688_v7 = vxor.u32 2147483648, %v683_v25 }
 0x177   :  { %v1644_v47 = vadd.s32 %v1642_v46, %v3716_v21  ;;  %v1657_v10 = vshll.u32 %v3638_v27, 16  ;;  %v692_v55 = vsel %vm690_vm4, %v691_v31, %v683_v25  ;;  %v4694_v14 = vshll.u32 %v3618_v13, 16  ;;  %v1346_v21 = vpop.permute.xlu1 %1345 }
 0x178   :  { %v1982_v18 = vadd.s32 %v1981_v38, %v4693_v4  ;;  %vm2768_vm9 = vcmp.lt.s32.totalorder %v2767_v20, 0  ;;  %v689_v2 = vsel %vm687_vm3, %v675_v50, %v688_v7  ;;  %v1309_v56 = vsel %vm1307_vm7, %v675_v50, %v688_v7 }
 0x179   :  { %v1531_v24 = vsel %vm2768_vm9, 0, %v2767_v20  ;;  %v4193_v29 = vadd.s32 %v4694_v14, %v3629_v54  ;;  %v1312_v16 = vsel %vm1310_vm8, %v691_v31, %v683_v25  ;;  %v693_v30 = vsel %vm686_vm2, %v689_v2, %v692_v55 }
 0x17a   :  { %v1983_v19 = vadd.s32 536870912, %v1982_v18  ;;  %v1532_v34 = vsub.s32 32, %v1531_v24  ;;  %v1313_v59 = vsel %vm1306_vm6, %v1309_v56, %v1312_v16  ;;  %v1536_v8 = vsub.s32 4294967266, %v1531_v24 }
 0x17b   :  { %vm1424_vm10 = vcmp.lt.s32.totalorder %v4695_v40, 0  ;;  %v1314_v1 = vsel %vm684_vm1, nan, %v1313_v59  ;;  %v1533_v54 = vshll.u32 %v4162_v28, %v1531_v24  ;;  %vm1663_vm12 = vc.u32 %v4193_v29, %v1657_v10 }
 0x17c   :  { %v4198_v52 = vshrl.u32 %v1983_v19, 30  ;;  %v1534_v44 = vshrl.u32 %v1516_v33, %v1532_v34  ;;  %v694_v45 = vsel %vm684_vm1, nan, %v693_v30  ;;  %v1322_v6 = vsub.f32 0.0, %v1314_v1  ;;  %v4699_v19 = vld [vmem:[#allocation14_spill] sm:$0xff] }
 0x17d   :  { %v1537_v48 = vadd.s32 127, %v1536_v8  ;;  %v1350_v11 = vsel %vm3973_vm5, %v3941_v60, %v1346_v21  ;;  %v1634_v61 = vshrl.u32 %v4696_v17, 16  ;;  %v1664_v28 = vsel %vm1663_vm12, 1, %v4580_v22  ;;  %v4697_v60 = vld [vmem:[#allocation49_spill] sm:$0xff] }
 0x17e   :  { %v1985_v0 = vshll.u32 %v4198_v52, 30  ;;  %v1535_v23 = vor.u32 %v1534_v44, %v1533_v54  ;;  %v1326_v39 = vsel %vm3973_vm5, %v1322_v6, %v1314_v1  ;;  %v1666_v36 = vadd.s32 %v1664_v28, %v4697_v60  ;;  %v4703_v6 = vld [vmem:[#allocation15_spill] sm:$0xff]  ;;  %v4704_v28 = vld [vmem:[#allocation37_spill] sm:$0xff] }
 0x17f   :  { %v1538_v58 = vshll.u32 %v1537_v48, 23  ;;  %v4228_v50 = vmul.u32 %v1782_v42, %v3751_v12  ;;  %v1354_v26 = vmul.f32 %v2817_v43, %v694_v45  ;;  %v1358_v38 = vmul.f32 %v1350_v11, %v1326_v39  ;;  %v4705_v39 = vld [vmem:[#allocation47_spill] sm:$0xff] }
 0x180   :  { %v4222_v35 = vsub.s32 %v1982_v18, %v1985_v0  ;;  %v1645_v46 = vadd.s32 %v1644_v47, %v1634_v61  ;;  %v1546_v31 = vsub.s32 4, %v4146_v53  ;;  %v4240_v33 = vmul.u32 %v1804_v15, %v3751_v12 }
 0x181   :  { %v1539_v25 = vor.u32 4788187, %v1538_v58  ;;  %v1362_v41 = vadd.f32 %v1358_v38, %v1354_v26  ;;  %v1636_v62 = vshrl.u32 %v3646_v37, 16  ;;  %v4698_v4 = vshrl.u32 %v3618_v13, 16 }
 0x182   :  { %vm1987_vm13 = vcmp.lt.s32.totalorder %v4222_v35, 0  ;;  %v1988_v20 = vsub.s32 0, %v4222_v35  ;;  %v1542_v47 = vcvt.s32.f32 %v1535_v23  ;;  %v1658_v24 = vshrl.u32 %v3638_v27, 16 }
 0x183   :  { %v1667_v18 = vadd.s32 %v1666_v36, %v4698_v4  ;;  %v1540_v7 = vand.u32 2147483647, %v1539_v25  ;;  %v4250_v14 = vmul.u32 %v1781_v32, %v4699_v19  ;;  %v1786_v2 = vmul.u32 %v1782_v42, %v4699_v19  ;;  %1366 = vst [vmem:[#allocation2 + $0x18] sm:$0xff] %v1362_v41 }
 0x184   :  { %v1989_v55 = vsel %vm1987_vm13, %v1988_v20, %v4222_v35  ;;  %v4255_v56 = vadd.s32 %v1645_v46, %v1636_v62  ;;  %v1787_v13 = vshll.u32 %v4228_v50, 16  ;;  %v1547_v34 = vsel %vm1424_vm10, %v1546_v31, %v4146_v53  ;;  %2718 = dma.vmem_to_hbm [thread:$0]  %s2711_s14, 512, %s2713_s1, [#allocation3], %s2885_s3, %s2885_s3, %s2886_s5   ;;  %v4314_v31 = vpop.permute.xlu0 %2672 }
 0x185   :  { %v1990_v37 = vclz %v1989_v55  ;;  %v1543_v16 = vmul.f32 %v1542_v47, %v1540_v7  ;;  %v1668_v30 = vadd.s32 %v1667_v18, %v1658_v24  ;;  %v4267_v5 = vmul.u32 %v1803_v57, %v3751_v12 }
 0x186   :  { %v4272_v32 = vmul.u32 %v1803_v57, %v4699_v19  ;;  %v4277_v53 = vadd.s32 %v4193_v29, %v1657_v10  ;;  %v1808_v59 = vmul.u32 %v1804_v15, %v4699_v19  ;;  %v1809_v21 = vshll.u32 %v4240_v33, 16 }
 0x187   :  { %v2776_v42 = vadd.s32 4294967294, %v1990_v37  ;;  %v4700_v12 = vand.u32 2147483647, %v4695_v40  ;;  %v1544_v8 = vxor.u32 2147483648, %v1543_v16  ;;  %v1672_v57 = vadd.s32 1, %v1668_v30 }
 0x188   :  { %vm1671_vm0 = vc.u32 %v4255_v56, %v4277_v53  ;;  %v1789_v27 = vshll.u32 %v4250_v14, 16  ;;  %vm4289_vm11 = vc.u32 %v4177_v51, %v1787_v13  ;;  %v1978_v54 = vadd.s32 %v4164_v9, %v4152_v3 }
 0x189   :  { %vm1423_vm14 = vcmp.le.f32.partialorder %v4700_v12, 0.7853982  ;;  %vm2777_vm15 = vcmp.lt.s32.totalorder %v2776_v42, 0  ;;  %v1545_v63 = vsel %vm1424_vm10, %v1544_v8, %v1543_v16  ;;  %vm1886_vm1 = vcmp.lt.s32.totalorder %v4703_v6, 0 }
 0x18a   :  { %v1549_v1 = vsel %vm1423_vm14, 0, %v1547_v34  ;;  %v1993_v15 = vsel %vm2777_vm15, 0, %v2776_v42  ;;  %v4296_v29 = vsel %vm1423_vm14, %v4695_v40, %v1545_v63  ;;  %vm1813_vm2 = vc.u32 %v4267_v5, %v1809_v21 }
 0x18b   :  { %v1994_v44 = vsub.s32 32, %v1993_v15  ;;  %v1998_v45 = vsub.s32 4294967266, %v1993_v15  ;;  %v1550_v48 = vmul.f32 %v4296_v29, %v4296_v29  ;;  %v2182_v0 = vadd.s32 3, %v1549_v1 }
 0x18c   :  { %v1673_v11 = vsel %vm1671_vm0, %v1672_v57, %v1668_v30  ;;  %v1995_v23 = vshll.u32 %v4222_v35, %v1993_v15  ;;  %v4706_v58 = vmul.u32 %v4704_v28, %v4705_v39  ;;  %v1792_v3 = vsel %vm4289_vm11, 1, %v4580_v22 }
 0x18d   :  { %v1996_v17 = vshrl.u32 %v1978_v54, %v1994_v44  ;;  %v1999_v61 = vadd.s32 127, %v1998_v45  ;;  %v1810_v9 = vshrl.u32 %v4240_v33, 16  ;;  %v1551_v36 = vmul.f32 -0.001358992, %v1550_v48 }
 0x18e   :  { %v1674_v60 = vadd.s32 %v1673_v11, %v4706_v58  ;;  %v1558_v43 = vmul.f32 -0.00019511016, %v1550_v48  ;;  %v1814_v26 = vsel %vm1813_vm2, 1, %v4580_v22  ;;  %v1793_v35 = vadd.s32 %v1787_v13, %v4177_v51  ;;  %v2679_v11 = vpop.permute.xlu0 %2678 }
 0x18f   :  { %v1997_v38 = vor.u32 %v1996_v17, %v1995_v23  ;;  %v2000_v46 = vshll.u32 %v1999_v61, 23  ;;  %v1552_v20 = vadd.f32 0.041655596, %v1551_v36  ;;  %v4316_v62 = vand.u32 3, %v1549_v1  ;;  %v2671_v61 = vpop.permute.xlu2 %2670 }
 0x190   :  { %v1675_v25 = vadd.s32 536870912, %v1674_v60  ;;  %v1559_v41 = vadd.f32 0.008332121, %v1558_v43  ;;  %v4318_v4 = vand.u32 3, %v2182_v0  ;;  %v2008_v7 = vsub.s32 4, %v4198_v52 }
 0x191   :  { %v2001_v18 = vor.u32 4788187, %v2000_v46  ;;  %v1794_v55 = vadd.s32 %v1792_v3, %v1786_v2  ;;  %v4323_v24 = vadd.s32 %v1814_v26, %v1808_v59  ;;  %v1553_v19 = vmul.f32 %v1552_v20, %v1550_v48 }
 0x192   :  { %v4321_v47 = vshrl.u32 %v1675_v25, 30  ;;  %v1560_v37 = vmul.f32 %v1559_v41, %v1550_v48  ;;  %v4707_v51 = vand.u32 2147483647, %v4703_v6  ;;  %v2004_v34 = vcvt.s32.f32 %v1997_v38 }
 0x193   :  { %v2002_v16 = vand.u32 2147483647, %v2001_v18  ;;  %v1554_v42 = vadd.f32 -0.4999988, %v1553_v19  ;;  %vm1571_vm4 = vcmp.eq.s32.totalorder %v4316_v62, 2  ;;  %vm1795_vm6 = vc.u32 %v1793_v35, %v1789_v27 }
 0x194   :  { %vm4327_vm3 = vcmp.le.f32.partialorder %v4707_v51, 0.7853982  ;;  %v1677_v30 = vshll.u32 %v4321_v47, 30  ;;  %v1561_v12 = vadd.f32 -0.16666654, %v1560_v37  ;;  %vm1568_vm7 = vcmp.eq.s32.totalorder %v4316_v62, 0 }
 0x195   :  { %vm2185_vm8 = vcmp.eq.s32.totalorder %v4318_v4, 0  ;;  %v2005_v2 = vmul.f32 %v2004_v34, %v2002_v16  ;;  %v2009_v59 = vsel %vm1886_vm1, %v2008_v7, %v4198_v52  ;;  %v4341_v1 = vadd.s32 %v1809_v21, %v4267_v5 }
 0x196   :  { %v4338_v8 = vsub.s32 %v1674_v60, %v1677_v30  ;;  %v1555_v57 = vmul.f32 %v1554_v42, %v1550_v48  ;;  %v1562_v10 = vmul.f32 %v1561_v12, %v1550_v48  ;;  %vm1567_vm9 = vcmp.lt.s32.totalorder %v4316_v62, 2 }
 0x197   :  { %vm2184_vm10 = vcmp.lt.s32.totalorder %v4318_v4, 2  ;;  %vm2188_vm12 = vcmp.eq.s32.totalorder %v4318_v4, 2  ;;  %v1796_v27 = vsel %vm1795_vm6, 1, %v4580_v22  ;;  %vm1565_vm13 = vweird.f32 %v4695_v40  ;;  %v2818_v4 = vld [vmem:[%s4472_s4] sm:$0xff] }
 0x198   :  { %v2006_v63 = vxor.u32 2147483648, %v2005_v2  ;;  %vm1679_vm14 = vcmp.lt.s32.totalorder %v4338_v8, 0  ;;  %v1680_v52 = vsub.s32 0, %v4338_v8  ;;  %v1811_v5 = vshll.u32 %v4272_v32, 16 }
 0x199   :  { %v1556_v21 = vadd.f32 1.0, %v1555_v57  ;;  %v1563_v15 = vadd.f32 1.0, %v1562_v10  ;;  %v2011_v54 = vsel %vm4327_vm3, 0, %v2009_v59  ;;  %v1670_v44 = vadd.s32 %v4277_v53, %v4255_v56 }
 0x19a   :  { %v2007_v45 = vsel %vm1886_vm1, %v2006_v63, %v2005_v2  ;;  %v1681_v48 = vsel %vm1679_vm14, %v1680_v52, %v4338_v8  ;;  %v1798_v0 = vadd.s32 %v1796_v27, %v1794_v55  ;;  %vm1817_vm15 = vc.u32 %v4341_v1, %v1811_v5 }
 0x19b   :  { %v1564_v23 = vmul.f32 %v1563_v15, %v4296_v29  ;;  %v1572_v17 = vxor.u32 2147483648, %v1556_v21  ;;  %v2010_v28 = vsel %vm4327_vm3, %v4703_v6, %v2007_v45  ;;  %v1682_v39 = vclz %v1681_v48 }
 0x19c   :  { %v2686_v56 = vsel %vm3973_vm5, %v2671_v61, %v2679_v11  ;;  %v2012_v53 = vmul.f32 %v2010_v28, %v2010_v28  ;;  %v2647_v58 = vadd.s32 3, %v2011_v54  ;;  %v1788_v60 = vshrl.u32 %v4228_v50, 16 }
 0x19d   :  { %v1569_v3 = vxor.u32 2147483648, %v1564_v23  ;;  %v2770_v36 = vadd.s32 4294967294, %v1682_v39  ;;  %v1790_v43 = vshrl.u32 %v4250_v14, 16  ;;  %v1818_v29 = vsel %vm1817_vm15, 1, %v4580_v22 }
 0x19e   :  { %v1573_v26 = vsel %vm1571_vm4, %v1572_v17, %v1564_v23  ;;  %v2013_v38 = vmul.f32 -0.001358992, %v2012_v53  ;;  %v2020_v46 = vmul.f32 -0.00019511016, %v2012_v53  ;;  %v1799_v25 = vadd.s32 %v1798_v0, %v1788_v60 }
 0x19f   :  { %v1570_v35 = vsel %vm1568_vm7, %v1556_v21, %v1569_v3  ;;  %v2187_v20 = vsel %vm2185_vm8, %v1556_v21, %v1569_v3  ;;  %v2190_v50 = vsel %vm2188_vm12, %v1572_v17, %v1564_v23  ;;  %vm2771_vm0 = vcmp.lt.s32.totalorder %v2770_v36, 0 }
 0x1a0   :  { %v1574_v14 = vsel %vm1567_vm9, %v1570_v35, %v1573_v26  ;;  %v2191_v22 = vsel %vm2184_vm10, %v2187_v20, %v2190_v50  ;;  %v2014_v41 = vadd.f32 0.041655596, %v2013_v38  ;;  %v2021_v18 = vadd.f32 0.008332121, %v2020_v46 }
 0x1a1   :  { %v1575_v7 = vsel %vm1565_vm13, nan, %v1574_v14  ;;  %v2192_v55 = vsel %vm1565_vm13, nan, %v2191_v22  ;;  %v1685_v19 = vsel %vm2771_vm0, 0, %v2770_v36  ;;  %v1820_v37 = vadd.s32 %v1818_v29, %v4323_v24  ;;  %v2685_v29 = vpop.permute.xlu0 %2684 }
 0x1a2   :  { %v2658_v51 = vsub.f32 0.0, %v2192_v55  ;;  %v2015_v13 = vmul.f32 %v2014_v41, %v2012_v53  ;;  %v2022_v16 = vmul.f32 %v2021_v18, %v2012_v53  ;;  %v1812_v62 = vshrl.u32 %v4272_v32, 16 }
 0x1a3   :  { %v2690_v34 = vmul.f32 %v2818_v4, %v1575_v7  ;;  %v1686_v30 = vsub.s32 32, %v1685_v19  ;;  %v1690_v42 = vsub.s32 4294967266, %v1685_v19  ;;  %v4389_v12 = vadd.s32 %v1799_v25, %v1790_v43  ;;  %v2677_v25 = vpop.permute.xlu2 %2676  ;;  %v2819_v4 = vld [vmem:[%s4472_s4 + $0x18] sm:$0xff] }
 0x1a4   :  { %v2662_v40 = vsel %vm3973_vm5, %v2658_v51, %v2192_v55  ;;  %v2016_v2 = vadd.f32 -0.4999988, %v2015_v13  ;;  %v2023_v59 = vadd.f32 -0.16666654, %v2022_v16  ;;  %v1687_v24 = vshll.u32 %v4338_v8, %v1685_v19  ;;  %v4710_v8 = vld [vmem:[#allocation23_spill] sm:$0xff] }
 0x1a5   :  { %v2694_v57 = vmul.f32 %v2686_v56, %v2662_v40  ;;  %v1688_v10 = vshrl.u32 %v1670_v44, %v1686_v30  ;;  %v1691_v27 = vadd.s32 127, %v1690_v42  ;;  %v1821_v32 = vadd.s32 %v1820_v37, %v1810_v9  ;;  %v4711_v44 = vld [vmem:[#allocation18_spill] sm:$0xff] }
 0x1a6   :  { %v2017_v63 = vmul.f32 %v2016_v2, %v2012_v53  ;;  %v2024_v52 = vmul.f32 %v2023_v59, %v2012_v53  ;;  %v2028_v21 = vand.u32 3, %v2011_v54  ;;  %v4397_v15 = vadd.s32 %v4341_v1, %v1811_v5  ;;  %v4712_v54 = vld [vmem:[#allocation50_spill] sm:$0xff] }
 0x1a7   :  { %v2698_v45 = vadd.f32 %v2694_v57, %v2690_v34  ;;  %v1689_v48 = vor.u32 %v1688_v10, %v1687_v24  ;;  %v1692_v0 = vshll.u32 %v1691_v27, 23  ;;  %v1822_v11 = vadd.s32 %v1821_v32, %v1812_v62 }
 0x1a8   :  { %v2018_v23 = vadd.f32 1.0, %v2017_v63  ;;  %v2025_v17 = vadd.f32 1.0, %v2024_v52  ;;  %v2648_v61 = vand.u32 3, %v2647_v58  ;;  %vm1825_vm11 = vc.u32 %v4389_v12, %v4397_v15 }
 0x1a9   :  { %vm1578_vm1 = vcmp.lt.s32.totalorder %v4710_v8, 0  ;;  %2702 = vst [vmem:[#allocation4] sm:$0xff] %v2698_v45  ;;  %v1693_v33 = vor.u32 4788187, %v1692_v0  ;;  %v1826_v9 = vadd.s32 1, %v1822_v11  ;;  %v1823_v39 = vmul.u32 %v4712_v54, %v4711_v44 }
 0x1aa   :  { %v2026_v1 = vmul.f32 %v2025_v17, %v2010_v28  ;;  %vm2029_vm2 = vcmp.lt.s32.totalorder %v2028_v21, 2  ;;  %v2034_v5 = vxor.u32 2147483648, %v2018_v23  ;;  %vm2030_vm3 = vcmp.eq.s32.totalorder %v2028_v21, 0 }
 0x1ab   :  { %v1694_v56 = vand.u32 2147483647, %v1693_v33  ;;  %v1696_v53 = vcvt.s32.f32 %v1689_v48  ;;  %v1827_v60 = vsel %vm1825_vm11, %v1826_v9, %v1822_v11  ;;  %vm2033_vm4 = vcmp.eq.s32.totalorder %v2028_v21, 2  ;;  %v4433_v48 = vpop.permute.xlu1 %2674 }
 0x1ac   :  { %v2031_v3 = vxor.u32 2147483648, %v2026_v1  ;;  %vm2649_vm6 = vcmp.lt.s32.totalorder %v2648_v61, 2  ;;  %v1828_v58 = vadd.s32 %v1827_v60, %v1823_v39  ;;  %v2035_v36 = vsel %vm2033_vm4, %v2034_v5, %v2026_v1 }
 0x1ad   :  { %vm2650_vm7 = vcmp.eq.s32.totalorder %v2648_v61, 0  ;;  %vm2653_vm8 = vcmp.eq.s32.totalorder %v2648_v61, 2  ;;  %v1697_v43 = vmul.f32 %v1696_v53, %v1694_v56  ;;  %vm2027_vm9 = vweird.f32 %v4703_v6 }
 0x1ae   :  { %v2032_v26 = vsel %vm2030_vm3, %v2018_v23, %v2031_v3  ;;  %v2652_v38 = vsel %vm2650_vm7, %v2018_v23, %v2031_v3  ;;  %v2655_v46 = vsel %vm2653_vm8, %v2034_v5, %v2026_v1  ;;  %v1829_v28 = vadd.s32 536870912, %v1828_v58 }
 0x1af   :  { %v2036_v35 = vsel %vm2029_vm2, %v2032_v26, %v2035_v36  ;;  %v2656_v20 = vsel %vm2649_vm6, %v2652_v38, %v2655_v46  ;;  %v1698_v50 = vxor.u32 2147483648, %v1697_v43  ;;  %v4713_v22 = vand.u32 2147483647, %v4710_v8 }
 0x1b0   :  { %v2657_v14 = vsel %vm2027_vm9, nan, %v2656_v20  ;;  %v1700_v18 = vsub.s32 4, %v4321_v47  ;;  %v4413_v7 = vshrl.u32 %v1829_v28, 30  ;;  %v2037_v55 = vsel %vm2027_vm9, nan, %v2036_v35 }
 0x1b1   :  { %vm4408_vm10 = vcmp.le.f32.partialorder %v4713_v22, 0.7853982  ;;  %v2661_v19 = vsub.f32 0.0, %v2657_v14  ;;  %v2689_v6 = vsel %vm3973_vm5, %v2677_v25, %v2685_v29  ;;  %v1699_v37 = vsel %vm1578_vm1, %v1698_v50, %v1697_v43 }
 0x1b2   :  { %v1702_v51 = vsel %vm4408_vm10, %v4710_v8, %v1699_v37  ;;  %v1831_v13 = vshll.u32 %v4413_v7, 30  ;;  %v2693_v34 = vmul.f32 %v2819_v4, %v2037_v55  ;;  %v1701_v42 = vsel %vm1578_vm1, %v1700_v18, %v4321_v47 }
 0x1b3   :  { %v2665_v16 = vsel %vm3973_vm5, %v2661_v19, %v2657_v14  ;;  %v1704_v62 = vmul.f32 %v1702_v51, %v1702_v51  ;;  %v1703_v10 = vsel %vm4408_vm10, 0, %v1701_v42  ;;  %v1824_v1 = vadd.s32 %v4397_v15, %v4389_v12  ;;  %v2681_v29 = vpop.permute.xlu1 %2680 }
 0x1b4   :  { %v2697_v30 = vmul.f32 %v2689_v6, %v2665_v16  ;;  %v1832_v40 = vsub.s32 %v1828_v58, %v1831_v13  ;;  %v2337_v0 = vadd.s32 3, %v1703_v10  ;;  %v1720_v33 = vand.u32 3, %v1703_v10  ;;  %v4716_v16 = vld [vmem:[#allocation46_spill] sm:$0xff] }
 0x1b5   :  { %v1705_v2 = vmul.f32 -0.001358992, %v1704_v62  ;;  %v1712_v59 = vmul.f32 -0.00019511016, %v1704_v62  ;;  %vm1719_vm3 = vweird.f32 %v4710_v8  ;;  %v2687_v14 = vsel %vm3973_vm5, %v4314_v31, %v2681_v29  ;;  %v2820_v8 = vld [vmem:[%s4472_s4 + $0x8] sm:$0xff] }
 0x1b6   :  { %v2701_v24 = vadd.f32 %v2697_v30, %v2693_v34  ;;  %vm1833_vm12 = vcmp.lt.s32.totalorder %v1832_v40, 0  ;;  %v1834_v57 = vsub.s32 0, %v1832_v40  ;;  %v2338_v9 = vand.u32 3, %v2337_v0 }
 0x1b7   :  { %v1706_v27 = vadd.f32 0.041655596, %v1705_v2  ;;  %v1713_v32 = vadd.f32 0.008332121, %v1712_v59  ;;  %vm1721_vm14 = vcmp.lt.s32.totalorder %v1720_v33, 2  ;;  %vm1722_vm15 = vcmp.eq.s32.totalorder %v1720_v33, 0 }
 0x1b8   :  { %2705 = vst [vmem:[#allocation4 + $0x18] sm:$0xff] %v2701_v24  ;;  %v1835_v63 = vsel %vm1833_vm12, %v1834_v57, %v1832_v40  ;;  %vm1725_vm0 = vcmp.eq.s32.totalorder %v1720_v33, 2  ;;  %vm2339_vm11 = vcmp.lt.s32.totalorder %v2338_v9, 2  ;;  %vm2340_vm1 = vcmp.eq.s32.totalorder %v2338_v9, 0 }
 0x1b9   :  { %v1707_v52 = vmul.f32 %v1706_v27, %v1704_v62  ;;  %v1714_v21 = vmul.f32 %v1713_v32, %v1704_v62  ;;  %v1836_v45 = vclz %v1835_v63  ;;  %vm2343_vm2 = vcmp.eq.s32.totalorder %v2338_v9, 2 }
 0x1ba   :  { %vm1732_vm4 = vcmp.lt.s32.totalorder %v4716_v16, 0  ;;  %v4717_v31 = vand.u32 2147483647, %v4716_v16  ;;  %v1854_v34 = vsub.s32 4, %v4413_v7 }
 0x1bb   :  { %v1708_v47 = vadd.f32 -0.4999988, %v1707_v52  ;;  %v1715_v11 = vadd.f32 -0.16666654, %v1714_v21  ;;  %v2773_v23 = vadd.s32 4294967294, %v1836_v45 }
 0x1bc   :  { %vm1731_vm6 = vcmp.le.f32.partialorder %v4717_v31, 0.7853982  ;;  %v1855_v59 = vsel %vm1732_vm4, %v1854_v34, %v4413_v7 }
 0x1bd   :  { %v1709_v17 = vmul.f32 %v1708_v47, %v1704_v62  ;;  %v1716_v61 = vmul.f32 %v1715_v11, %v1704_v62  ;;  %vm2774_vm13 = vcmp.lt.s32.totalorder %v2773_v23, 0  ;;  %v1857_v10 = vsel %vm1731_vm6, 0, %v1855_v59 }
 0x1be   :  { %v1839_v44 = vsel %vm2774_vm13, 0, %v2773_v23  ;;  %v2492_v21 = vadd.s32 3, %v1857_v10  ;;  %v1874_v23 = vand.u32 3, %v1857_v10 }
 0x1bf   :  { %v1710_v54 = vadd.f32 1.0, %v1709_v17  ;;  %v1717_v39 = vadd.f32 1.0, %v1716_v61  ;;  %v1840_v5 = vsub.s32 32, %v1839_v44  ;;  %v1844_v56 = vsub.s32 4294967266, %v1839_v44 }
 0x1c0   :  { %v1841_v58 = vshll.u32 %v1832_v40, %v1839_v44  ;;  %v2493_v17 = vand.u32 3, %v2492_v21  ;;  %vm1875_vm7 = vcmp.lt.s32.totalorder %v1874_v23, 2  ;;  %vm1876_vm8 = vcmp.eq.s32.totalorder %v1874_v23, 0 }
 0x1c1   :  { %v1718_v53 = vmul.f32 %v1717_v39, %v1702_v51  ;;  %v1726_v60 = vxor.u32 2147483648, %v1710_v54  ;;  %v1842_v3 = vshrl.u32 %v1824_v1, %v1840_v5  ;;  %v1845_v36 = vadd.s32 127, %v1844_v56 }
 0x1c2   :  { %vm1879_vm9 = vcmp.eq.s32.totalorder %v1874_v23, 2  ;;  %vm2494_vm10 = vcmp.lt.s32.totalorder %v2493_v17, 2  ;;  %vm2495_vm12 = vcmp.eq.s32.totalorder %v2493_v17, 0  ;;  %vm2498_vm13 = vcmp.eq.s32.totalorder %v2493_v17, 2 }
 0x1c3   :  { %v1723_v43 = vxor.u32 2147483648, %v1718_v53  ;;  %v1843_v26 = vor.u32 %v1842_v3, %v1841_v58  ;;  %v1846_v38 = vshll.u32 %v1845_v36, 23  ;;  %v1727_v25 = vsel %vm1725_vm0, %v1726_v60, %v1718_v53 }
 0x1c4   :  { %v2345_v15 = vsel %vm2343_vm2, %v1726_v60, %v1718_v53  ;;  %v2683_v53 = vpop.permute.xlu2 %2682 }
 0x1c5   :  { %v1724_v46 = vsel %vm1722_vm15, %v1710_v54, %v1723_v43  ;;  %v2342_v12 = vsel %vm2340_vm1, %v1710_v54, %v1723_v43  ;;  %v1847_v20 = vor.u32 4788187, %v1846_v38  ;;  %v1850_v55 = vcvt.s32.f32 %v1843_v26  ;;  %v2821_v43 = vld [vmem:[%s4472_s4 + $0x10] sm:$0xff] }
 0x1c6   :  { %v1728_v28 = vsel %vm1721_vm14, %v1724_v46, %v1727_v25  ;;  %v2346_v35 = vsel %vm2339_vm11, %v2342_v12, %v2345_v15  ;;  %vm1873_vm14 = vweird.f32 %v4716_v16  ;;  %v2688_v36 = vsel %vm3973_vm5, %v4433_v48, %v2683_v53 }
 0x1c7   :  { %v2347_v50 = vsel %vm1719_vm3, nan, %v2346_v35  ;;  %v1729_v22 = vsel %vm1719_vm3, nan, %v1728_v28  ;;  %v1848_v18 = vand.u32 2147483647, %v1847_v20 }
 0x1c8   :  { %v2659_v41 = vsub.f32 0.0, %v2347_v50  ;;  %v2691_v37 = vmul.f32 %v2820_v8, %v1729_v22 }
 0x1c9   :  { %v1851_v6 = vmul.f32 %v1850_v55, %v1848_v18 }
 0x1ca   :  { %v2663_v19 = vsel %vm3973_vm5, %v2659_v41, %v2347_v50 }
 0x1cb   :  { %v2695_v51 = vmul.f32 %v2687_v14, %v2663_v19  ;;  %v1852_v13 = vxor.u32 2147483648, %v1851_v6 }
 0x1cd   :  { %v2699_v62 = vadd.f32 %v2695_v51, %v2691_v37  ;;  %v1853_v4 = vsel %vm1732_vm4, %v1852_v13, %v1851_v6 }
 0x1ce   :  { %v1856_v30 = vsel %vm1731_vm6, %v4716_v16, %v1853_v4 }
 0x1cf   :  { %2703 = vst [vmem:[#allocation4 + $0x8] sm:$0xff] %v2699_v62  ;;  %v1858_v42 = vmul.f32 %v1856_v30, %v1856_v30 }
 0x1d1   :  { %v1859_v40 = vmul.f32 -0.001358992, %v1858_v42  ;;  %v1866_v2 = vmul.f32 -0.00019511016, %v1858_v42 }
 0x1d3   :  { %v1860_v24 = vadd.f32 0.041655596, %v1859_v40  ;;  %v1867_v57 = vadd.f32 0.008332121, %v1866_v2 }
 0x1d5   :  { %v1861_v27 = vmul.f32 %v1860_v24, %v1858_v42  ;;  %v1868_v32 = vmul.f32 %v1867_v57, %v1858_v42 }
 0x1d7   :  { %v1862_v63 = vadd.f32 -0.4999988, %v1861_v27  ;;  %v1869_v52 = vadd.f32 -0.16666654, %v1868_v32 }
 0x1d9   :  { %v1863_v45 = vmul.f32 %v1862_v63, %v1858_v42  ;;  %v1870_v0 = vmul.f32 %v1869_v52, %v1858_v42 }
 0x1db   :  { %v1864_v47 = vadd.f32 1.0, %v1863_v45  ;;  %v1871_v11 = vadd.f32 1.0, %v1870_v0 }
 0x1dd   :  { %v1872_v61 = vmul.f32 %v1871_v11, %v1856_v30  ;;  %v1880_v33 = vxor.u32 2147483648, %v1864_v47 }
 0x1df   :  { %v1877_v9 = vxor.u32 2147483648, %v1872_v61  ;;  %v1881_v44 = vsel %vm1879_vm9, %v1880_v33, %v1872_v61  ;;  %v2500_v39 = vsel %vm2498_vm13, %v1880_v33, %v1872_v61 }
 0x1e1   :  { %v1878_v7 = vsel %vm1876_vm8, %v1864_v47, %v1877_v9  ;;  %v2497_v54 = vsel %vm2495_vm12, %v1864_v47, %v1877_v9 }
 0x1e2   :  { %v1882_v1 = vsel %vm1875_vm7, %v1878_v7, %v1881_v44  ;;  %v2501_v5 = vsel %vm2494_vm10, %v2497_v54, %v2500_v39 }
 0x1e3   :  { %v2502_v56 = vsel %vm1873_vm14, nan, %v2501_v5  ;;  %v1883_v60 = vsel %vm1873_vm14, nan, %v1882_v1 }
 0x1e4   :  { %v2660_v3 = vsub.f32 0.0, %v2502_v56  ;;  %v2692_v29 = vmul.f32 %v2821_v43, %v1883_v60 }
 0x1e6   :  { %v2664_v58 = vsel %vm3973_vm5, %v2660_v3, %v2502_v56 }
 0x1e7   :  { %v2696_v26 = vmul.f32 %v2688_v36, %v2664_v58 }
 0x1e9   :  { %v2700_v38 = vadd.f32 %v2696_v26, %v2692_v29 }
 0x1eb   :  { %2704 = vst [vmem:[#allocation4 + $0x10] sm:$0xff] %v2700_v38 }
 0x1ec   :  { %2731 = dma.vmem_to_hbm [thread:$0]  %s2724_s26, 512, %s2726_s29, [#allocation5], %s2885_s3, %s2885_s3, %s2886_s5  }
 0x1ed   :  { %2870 = dma.done.wait [#allocation3], 512  }
 0x1ee   :  { %2871 = vsyncadd [#allocation3], 4294966784 }
 0x1ef   :  { %2872 = dma.done.wait [#allocation5], 512  }
 0x1f0   :  { %2873 = vsyncadd [#allocation5], 4294966784 }
 0x1f1   :  { %2740 = vsyncpa [#allocation3], 1 }
 0x1f2   :  { %2741 = vsyncpa [#allocation5], 1 }

</bundles_post_ra>
